<compile_context>
chip_gen: v7x
topology: tpu7x:2x2x1
jax: 0.10.0
libtpu: 0.0.40
codegen_flags: <defaults>
</compile_context>

<pallas_src>
import math
import functools

import jax
import jax.numpy as jnp
from jax.experimental import pallas as pl
from jax.experimental.pallas import tpu as pltpu

# ----------------------- config (small, consistent with the module) -----------------------
BATCH = 2
SEQ = 8
HIDDEN = 64
NUM_HEADS = 4
HEAD_DIM = 16            # NUM_HEADS * HEAD_DIM == HIDDEN
NUM_KV_HEADS = 2
N_REP = NUM_HEADS // NUM_KV_HEADS
INTERMEDIATE = 128
MAX_POS = 64
ROPE_BASE = 10000.0
RMS_EPS = 1e-6


# ----------------------- Pallas kernel -----------------------
def _decoder_layer_kernel(h_ref, mask_ref, cos_ref, sin_ref,
                          wqkv_ref, wo_ref, wgu_ref, wd_ref,
                          ln1_ref, ln2_ref,
                          out_ref, *maybe_aw_ref,
                          block_b, seq, num_heads, num_kv_heads, head_dim,
                          intermediate, eps, output_attentions):
    bb, S, hd = block_b, seq, head_dim
    NH, NKV, I = num_heads, num_kv_heads, intermediate
    n_rep = NH // NKV
    G = bb * NH

    # ---- load the (bb, S, H) activation block as one flat (bb*S, H) slab ----
    x = jnp.concatenate([h_ref[b] for b in range(bb)], axis=0).astype(jnp.float32)
    mask = mask_ref[...].astype(jnp.float32)                    # (bb, 1, S, S)
    cos = cos_ref[...].astype(jnp.float32)[:, None]             # (bb, 1, S, hd)
    sin = sin_ref[...].astype(jnp.float32)[:, None]
    ln1 = ln1_ref[...].astype(jnp.float32)                      # (1, H)
    ln2 = ln2_ref[...].astype(jnp.float32)

    def rmsnorm(t, w):
        var = jnp.mean(t * t, axis=-1, keepdims=True)
        return (t * jax.lax.rsqrt(var + eps)) * w

    def rot_half(t):
        # rotate_half on the per-head minor dim, batched over (batch, head).
        return jnp.concatenate([-t[..., hd // 2:], t[..., :hd // 2]], axis=-1)

    def split_heads(t, head_map):
        # t: (bb*S, n*hd) -> (bb, len(head_map), S, hd) using only static slices
        # and leading-dim stacks (safe Mosaic relayouts).
        per_b = []
        for b in range(bb):
            rows = t[b * S:(b + 1) * S]                         # (S, n*hd)
            per_b.append(jnp.stack(
                [rows[:, g * hd:(g + 1) * hd] for g in head_map], axis=0))
        return jnp.stack(per_b, axis=0)

    # ---- input RMSNorm + fused q|k|v projection (single lane-dense matmul) ----
    xn = rmsnorm(x, ln1)
    qkv = jnp.dot(xn, wqkv_ref[...], preferred_element_type=jnp.float32)  # (bb*S, (NH+2*NKV)*hd)
    q_end = NH * hd
    k_end = q_end + NKV * hd
    q = qkv[:, :q_end] * (1.0 / math.sqrt(hd))   # fold softmax scale into q once
    k = qkv[:, q_end:k_end]
    v = qkv[:, k_end:]

    # ---- RoPE, batched over (batch, head) ----
    q4 = split_heads(q, list(range(NH)))                        # (bb, NH,  S, hd)
    k4 = split_heads(k, list(range(NKV)))                       # (bb, NKV, S, hd)
    v4 = split_heads(v, [h // n_rep for h in range(NH)])        # (bb, NH,  S, hd)
    q4 = q4 * cos + rot_half(q4) * sin
    k4 = k4 * cos + rot_half(k4) * sin
    # GQA repeat_kv (head h uses kv-head h // n_rep)
    k4 = jnp.concatenate(
        [k4[:, h // n_rep:h // n_rep + 1] for h in range(NH)], axis=1)

    # ---- attention: one batched matmul over all (batch, head) pairs ----
    q3 = q4.reshape(G, S, hd)
    k3 = k4.reshape(G, S, hd)
    v3 = v4.reshape(G, S, hd)
    scores = jnp.einsum('gqd,gkd->gqk', q3, k3,
                        preferred_element_type=jnp.float32).reshape(bb, NH, S, S)
    scores = scores + mask                                      # additive mask
    m = jnp.max(scores, axis=-1, keepdims=True)
    p = jnp.exp(scores - m)
    attn = p / jnp.sum(p, axis=-1, keepdims=True)               # (bb, NH, S, S), fp32 softmax
    if output_attentions:
        maybe_aw_ref[0][...] = attn.astype(maybe_aw_ref[0].dtype)   # single store

    ctx = jnp.einsum('gqk,gkd->gqd', attn.reshape(G, S, S), v3,
                     preferred_element_type=jnp.float32).reshape(bb, NH, S, hd)
    attn_out = jnp.concatenate(
        [jnp.concatenate([ctx[b, h] for h in range(NH)], axis=-1)    # (S, H)
         for b in range(bb)], axis=0)                                # (bb*S, H)

    # ---- output projection + residual ----
    h1 = x + jnp.dot(attn_out, wo_ref[...], preferred_element_type=jnp.float32)

    # ---- post-attention RMSNorm + fused SwiGLU MLP + residual ----
    h1n = rmsnorm(h1, ln2)
    gu = jnp.dot(h1n, wgu_ref[...], preferred_element_type=jnp.float32)   # (bb*S, 2*I)
    gate = gu[:, :I]
    up = gu[:, I:]
    mlp = jnp.dot(gate * jax.nn.sigmoid(gate) * up, wd_ref[...],
                  preferred_element_type=jnp.float32)                     # (bb*S, H)

    y = h1 + mlp
    for b in range(bb):
        out_ref[b] = y[b * S:(b + 1) * S].astype(out_ref.dtype)


# ----------------------- wrapper -----------------------
def _default_block_batch(batch):
    """v7x has 2 TensorCores/chip: keep one batch per grid step so the 'parallel'
    grid axis is split across cores. Single-TC chips (v5e/v6e): fold the whole
    batch into a single grid step (bigger matmul M dim, no serial grid overhead)."""
    try:
        kind = jax.devices()[0].device_kind.lower()
    except Exception:
        kind = ""
    if "7" in kind:          # e.g. "TPU7x" / "TPU v7x"
        return 1
    return batch


def llama_decoder_layer(hidden_states, attention_mask, cos_pos, sin_pos, params,
                        output_attentions=True, block_batch=None):
    B, S, H = hidden_states.shape
    hd = HEAD_DIM
    I = INTERMEDIATE
    bb = _default_block_batch(B) if block_batch is None else block_batch
    assert B % bb == 0

    # Fused, pre-transposed weights -> lane-dense matmul outputs (128 / 256 wide).
    w_qkv = jnp.concatenate([params['wq'], params['wk'], params['wv']], axis=1)  # (H, 128)
    w_gu = jnp.concatenate([params['wg'], params['wu']], axis=1)                 # (H, 256)
    wo, wd, ln1, ln2 = params['wo'], params['wd'], params['ln1'], params['ln2']

    kernel = functools.partial(
        _decoder_layer_kernel,
        block_b=bb, seq=S, num_heads=NUM_HEADS, num_kv_heads=NUM_KV_HEADS,
        head_dim=hd, intermediate=I, eps=RMS_EPS,
        output_attentions=output_attentions)

    def full_spec(arr):  # whole weight resident in VMEM (fine at these toy sizes)
        return pl.BlockSpec(arr.shape, lambda i: (0, 0))

    in_specs = [
        pl.BlockSpec((bb, S, H), lambda i: (i, 0, 0)),        # hidden_states
        pl.BlockSpec((bb, 1, S, S), lambda i: (i, 0, 0, 0)),  # attention_mask
        pl.BlockSpec((bb, S, hd), lambda i: (i, 0, 0)),       # cos (gathered by position_ids)
        pl.BlockSpec((bb, S, hd), lambda i: (i, 0, 0)),       # sin
        full_spec(w_qkv), full_spec(wo), full_spec(w_gu), full_spec(wd),
        full_spec(ln1), full_spec(ln2),
    ]
    out_specs = [pl.BlockSpec((bb, S, H), lambda i: (i, 0, 0))]
    out_shapes = [jax.ShapeDtypeStruct((B, S, H), hidden_states.dtype)]
    if output_attentions:
        out_specs.append(pl.BlockSpec((bb, NUM_HEADS, S, S), lambda i: (i, 0, 0, 0)))
        out_shapes.append(jax.ShapeDtypeStruct((B, NUM_HEADS, S, S), jnp.float32))

    grid_spec = pltpu.PrefetchScalarGridSpec(
        num_scalar_prefetch=0,
        grid=(B // bb,),
        in_specs=in_specs,
        out_specs=out_specs,
    )

    # Advisory cost hint so XLA can schedule the surrounding graph around this call.
    flops = 2 * B * S * H * (NUM_HEADS + 2 * NUM_KV_HEADS) * hd   # fused qkv
    flops += 2 * B * NUM_HEADS * S * S * hd * 2                   # scores + attn@v
    flops += 2 * B * S * H * H                                    # o_proj
    flops += 2 * B * S * H * (2 * I)                              # fused gate|up
    flops += 2 * B * S * I * H                                    # down_proj
    transcendentals = B * NUM_HEADS * S * S + B * S * I + 2 * B * S
    args = (hidden_states, attention_mask, cos_pos, sin_pos,
            w_qkv, wo, w_gu, wd, ln1, ln2)
    bytes_accessed = int(sum(a.size * a.dtype.itemsize for a in args))
    bytes_accessed += int(sum(math.prod(s.shape) * jnp.dtype(s.dtype).itemsize
                              for s in out_shapes))
    cost = pl.CostEstimate(flops=int(flops),
                           transcendentals=int(transcendentals),
                           bytes_accessed=bytes_accessed)

    outs = pl.pallas_call(
        kernel,
        out_shape=tuple(out_shapes),
        grid_spec=grid_spec,
        compiler_params=pltpu.CompilerParams(
            dimension_semantics=("parallel",)),
        cost_estimate=cost,
    )(*args)

    if output_attentions:
        out, attn_w = outs
        return out, attn_w
    out = outs[0] if isinstance(outs, (tuple, list)) else outs
    return out, None


# ----------------------- pure-JAX reference (for correctness check) -----------------------
def reference_layer(hidden_states, attention_mask, cos_pos, sin_pos, params):
    x = hidden_states.astype(jnp.float32)

    def rmsnorm(t, w):
        var = jnp.mean(t * t, axis=-1, keepdims=True)
        return (t * jax.lax.rsqrt(var + RMS_EPS)) * w[0]

    def rotate_half(t):
        half = t.shape[-1] // 2
        return jnp.concatenate([-t[..., half:], t[..., :half]], axis=-1)

    B, S, H = x.shape
    xn = rmsnorm(x, params['ln1'])
    q = xn @ params['wq']
    k = xn @ params['wk']
    v = xn @ params['wv']
    q = q.reshape(B, S, NUM_HEADS, HEAD_DIM).transpose(0, 2, 1, 3)
    k = k.reshape(B, S, NUM_KV_HEADS, HEAD_DIM).transpose(0, 2, 1, 3)
    v = v.reshape(B, S, NUM_KV_HEADS, HEAD_DIM).transpose(0, 2, 1, 3)
    cos = cos_pos[:, None, :, :]
    sin = sin_pos[:, None, :, :]
    q = q * cos + rotate_half(q) * sin
    k = k * cos + rotate_half(k) * sin
    k = jnp.repeat(k, N_REP, axis=1)
    v = jnp.repeat(v, N_REP, axis=1)
    scores = jnp.einsum('bhqd,bhkd->bhqk', q, k) / math.sqrt(HEAD_DIM)
    scores = scores + attention_mask
    attn = jax.nn.softmax(scores.astype(jnp.float32), axis=-1)
    ao = jnp.einsum('bhqk,bhkd->bhqd', attn, v)
    ao = ao.transpose(0, 2, 1, 3).reshape(B, S, H)
    o = ao @ params['wo']
    h1 = x + o
    h1n = rmsnorm(h1, params['ln2'])
    gate = h1n @ params['wg']
    up = h1n @ params['wu']
    mlp = (gate * jax.nn.sigmoid(gate) * up) @ params['wd']
    return h1 + mlp, attn


# ----------------------- setup & main -----------------------
def make_params(key):
    keys = jax.random.split(key, 7)
    s = 0.02
    return {
        # nn.Linear weight is (out, in); store pre-transposed (in, out) so kernel does x @ W.
        'wq': s * jax.random.normal(keys[0], (HIDDEN, NUM_HEADS * HEAD_DIM), jnp.float32),
        'wk': s * jax.random.normal(keys[1], (HIDDEN, NUM_KV_HEADS * HEAD_DIM), jnp.float32),
        'wv': s * jax.random.normal(keys[2], (HIDDEN, NUM_KV_HEADS * HEAD_DIM), jnp.float32),
        'wo': s * jax.random.normal(keys[3], (HIDDEN, HIDDEN), jnp.float32),
        'wg': s * jax.random.normal(keys[4], (HIDDEN, INTERMEDIATE), jnp.float32),
        'wu': s * jax.random.normal(keys[5], (HIDDEN, INTERMEDIATE), jnp.float32),
        'wd': s * jax.random.normal(keys[6], (INTERMEDIATE, HIDDEN), jnp.float32),
        'ln1': jnp.ones((1, HIDDEN), jnp.float32),
        'ln2': jnp.ones((1, HIDDEN), jnp.float32),
    }


def rope_tables(position_ids):
    inv_freq = 1.0 / (ROPE_BASE ** (jnp.arange(0, HEAD_DIM, 2, dtype=jnp.float32) / HEAD_DIM))
    t = jnp.arange(MAX_POS, dtype=jnp.float32)
    freqs = jnp.einsum('i,j->ij', t, inv_freq)
    emb = jnp.concatenate([freqs, freqs], axis=-1)        # (MAX_POS, HEAD_DIM)
    cos_cached = jnp.cos(emb)
    sin_cached = jnp.sin(emb)
    # apply_rotary_pos_emb gathers cos/sin by position_ids: (B, S, HEAD_DIM)
    return cos_cached[position_ids], sin_cached[position_ids]


if __name__ == "__main__":
    key = jax.random.PRNGKey(0)
    kp, kx = jax.random.split(key)
    params = make_params(kp)

    hidden_states = jax.random.normal(kx, (BATCH, SEQ, HIDDEN), jnp.float32)

    # causal additive attention mask (B, 1, S, S)
    i = jnp.arange(SEQ)[:, None]
    j = jnp.arange(SEQ)[None, :]
    causal = jnp.where(j <= i, 0.0, -1e9).astype(jnp.float32)
    attention_mask = jnp.broadcast_to(causal, (BATCH, 1, SEQ, SEQ))

    position_ids = jnp.broadcast_to(jnp.arange(SEQ), (BATCH, SEQ))
    cos_pos, sin_pos = rope_tables(position_ids)

    out, attn_w = llama_decoder_layer(hidden_states, attention_mask, cos_pos, sin_pos, params)
    out = jax.block_until_ready(out)
    attn_w = jax.block_until_ready(attn_w)

    ref_out, ref_attn = reference_layer(hidden_states, attention_mask, cos_pos, sin_pos, params)

    assert jnp.allclose(out, ref_out, rtol=1e-4, atol=1e-4), "hidden_states mismatch"
    assert jnp.allclose(attn_w, ref_attn, rtol=1e-4, atol=1e-4), "attn_weights mismatch"

    # TODO(synk): past_key_value cache concat / use_cache path not implemented (None in this run).
    print("KERNEL_OK")
</pallas_src>

<mosaic_0001>
module attributes {stable_mosaic.version = 11 : i64} {
  func.func @_decoder_layer_kernel(%arg0: i32, %arg1: memref<2x8x64xf32, #tpu.memory_space<vmem>>, %arg2: memref<2x1x8x8xf32, #tpu.memory_space<vmem>>, %arg3: memref<2x8x16xf32, #tpu.memory_space<vmem>>, %arg4: memref<2x8x16xf32, #tpu.memory_space<vmem>>, %arg5: memref<64x128xf32, #tpu.memory_space<vmem>>, %arg6: memref<64x64xf32, #tpu.memory_space<vmem>>, %arg7: memref<64x256xf32, #tpu.memory_space<vmem>>, %arg8: memref<128x64xf32, #tpu.memory_space<vmem>>, %arg9: memref<1x64xf32, #tpu.memory_space<vmem>>, %arg10: memref<1x64xf32, #tpu.memory_space<vmem>>, %arg11: memref<2x8x64xf32, #tpu.memory_space<vmem>>, %arg12: memref<2x4x8x8xf32, #tpu.memory_space<vmem>>) attributes {dimension_semantics = [#tpu.dimension_semantics<parallel>], iteration_bounds = array<i64: 1>, scalar_prefetch = 0 : i64, scratch_operands = 0 : i64, tpu.core_type = #tpu.core_type<tc>, window_params = [{transform_indices = @transform_0, window_bounds = array<i64: 2, 8, 64>}, {transform_indices = @transform_1, window_bounds = array<i64: 2, 1, 8, 8>}, {transform_indices = @transform_2, window_bounds = array<i64: 2, 8, 16>}, {transform_indices = @transform_3, window_bounds = array<i64: 2, 8, 16>}, {pipeline_mode = #tpu.pipeline_mode<synchronous>, transform_indices = @transform_4, window_bounds = array<i64: 64, 128>}, {pipeline_mode = #tpu.pipeline_mode<synchronous>, transform_indices = @transform_5, window_bounds = array<i64: 64, 64>}, {pipeline_mode = #tpu.pipeline_mode<synchronous>, transform_indices = @transform_6, window_bounds = array<i64: 64, 256>}, {pipeline_mode = #tpu.pipeline_mode<synchronous>, transform_indices = @transform_7, window_bounds = array<i64: 128, 64>}, {pipeline_mode = #tpu.pipeline_mode<synchronous>, transform_indices = @transform_8, window_bounds = array<i64: 1, 64>}, {pipeline_mode = #tpu.pipeline_mode<synchronous>, transform_indices = @transform_9, window_bounds = array<i64: 1, 64>}, {transform_indices = @transform_10, window_bounds = array<i64: 2, 8, 64>}, {transform_indices = @transform_11, window_bounds = array<i64: 2, 4, 8, 8>}]} {
    %c0 = arith.constant 0 : index
    %c0_0 = arith.constant 0 : index
    %c0_1 = arith.constant 0 : index
    %0 = vector.load %arg1[%c0, %c0_0, %c0_1] : memref<2x8x64xf32, #tpu.memory_space<vmem>>, vector<1x8x64xf32>
    %1 = vector.shape_cast %0 : vector<1x8x64xf32> to vector<8x64xf32>
    %c1 = arith.constant 1 : index
    %c0_2 = arith.constant 0 : index
    %c0_3 = arith.constant 0 : index
    %2 = vector.load %arg1[%c1, %c0_2, %c0_3] : memref<2x8x64xf32, #tpu.memory_space<vmem>>, vector<1x8x64xf32>
    %3 = vector.shape_cast %2 : vector<1x8x64xf32> to vector<8x64xf32>
    %4 = tpu.concatenate %1, %3 in 0 : vector<8x64xf32>, vector<8x64xf32> -> vector<16x64xf32>
    %c0_4 = arith.constant 0 : index
    %c0_5 = arith.constant 0 : index
    %c0_6 = arith.constant 0 : index
    %c0_7 = arith.constant 0 : index
    %5 = vector.load %arg2[%c0_4, %c0_5, %c0_6, %c0_7] : memref<2x1x8x8xf32, #tpu.memory_space<vmem>>, vector<2x1x8x8xf32>
    %c0_8 = arith.constant 0 : index
    %c0_9 = arith.constant 0 : index
    %c0_10 = arith.constant 0 : index
    %6 = vector.load %arg3[%c0_8, %c0_9, %c0_10] : memref<2x8x16xf32, #tpu.memory_space<vmem>>, vector<2x8x16xf32>
    %7 = vector.shape_cast %6 : vector<2x8x16xf32> to vector<2x1x8x16xf32>
    %c0_11 = arith.constant 0 : index
    %c0_12 = arith.constant 0 : index
    %c0_13 = arith.constant 0 : index
    %8 = vector.load %arg4[%c0_11, %c0_12, %c0_13] : memref<2x8x16xf32, #tpu.memory_space<vmem>>, vector<2x8x16xf32>
    %9 = vector.shape_cast %8 : vector<2x8x16xf32> to vector<2x1x8x16xf32>
    %c0_14 = arith.constant 0 : index
    %c0_15 = arith.constant 0 : index
    %10 = vector.load %arg9[%c0_14, %c0_15] : memref<1x64xf32, #tpu.memory_space<vmem>>, vector<1x64xf32>
    %c0_16 = arith.constant 0 : index
    %c0_17 = arith.constant 0 : index
    %11 = vector.load %arg10[%c0_16, %c0_17] : memref<1x64xf32, #tpu.memory_space<vmem>>, vector<1x64xf32>
    %12 = arith.mulf %4, %4 : vector<16x64xf32>
    %cst = arith.constant dense<0.000000e+00> : vector<16xf32>
    %13 = vector.multi_reduction <add>, %12, %cst [1] : vector<16x64xf32> to vector<16xf32>
    %14 = vector.shape_cast %13 : vector<16xf32> to vector<16x1xf32>
    %cst_18 = arith.constant 6.400000e+01 : f32
    %15 = vector.broadcast %cst_18 : f32 to vector<16x1xf32>
    %16 = arith.divf %14, %15 : vector<16x1xf32>
    %cst_19 = arith.constant 9.99999997E-7 : f32
    %17 = vector.broadcast %cst_19 : f32 to vector<16x1xf32>
    %18 = arith.addf %16, %17 : vector<16x1xf32>
    %19 = math.rsqrt %18 : vector<16x1xf32>
    %20 = vector.broadcast %19 : vector<16x1xf32> to vector<16x64xf32>
    %21 = arith.mulf %4, %20 : vector<16x64xf32>
    %22 = vector.broadcast %10 : vector<1x64xf32> to vector<16x64xf32>
    %23 = arith.mulf %21, %22 : vector<16x64xf32>
    %c0_20 = arith.constant 0 : index
    %c0_21 = arith.constant 0 : index
    %24 = vector.load %arg5[%c0_20, %c0_21] : memref<64x128xf32, #tpu.memory_space<vmem>>, vector<64x128xf32>
    %cst_22 = arith.constant dense<0.000000e+00> : vector<16x128xf32>
    %25 = tpu.matmul %23, %24, %cst_22 {dimension_numbers = #tpu.dot_dimension_numbers<[1], [0], [0], [1], [0, 0, 1, 1], [], []>} : vector<16x64xf32>, vector<64x128xf32>, vector<16x128xf32> -> vector<16x128xf32>
    %26 = vector.extract_strided_slice %25 {offsets = [0, 0], sizes = [16, 64], strides = [1, 1]} : vector<16x128xf32> to vector<16x64xf32>
    %cst_23 = arith.constant 2.500000e-01 : f32
    %27 = vector.broadcast %cst_23 : f32 to vector<16x64xf32>
    %28 = arith.mulf %26, %27 : vector<16x64xf32>
    %29 = vector.extract_strided_slice %25 {offsets = [0, 64], sizes = [16, 32], strides = [1, 1]} : vector<16x128xf32> to vector<16x32xf32>
    %30 = vector.extract_strided_slice %25 {offsets = [0, 96], sizes = [16, 32], strides = [1, 1]} : vector<16x128xf32> to vector<16x32xf32>
    %31 = vector.extract_strided_slice %28 {offsets = [0, 0], sizes = [8, 64], strides = [1, 1]} : vector<16x64xf32> to vector<8x64xf32>
    %32 = vector.extract_strided_slice %31 {offsets = [0, 0], sizes = [8, 16], strides = [1, 1]} : vector<8x64xf32> to vector<8x16xf32>
    %33 = vector.extract_strided_slice %31 {offsets = [0, 16], sizes = [8, 16], strides = [1, 1]} : vector<8x64xf32> to vector<8x16xf32>
    %34 = vector.extract_strided_slice %31 {offsets = [0, 32], sizes = [8, 16], strides = [1, 1]} : vector<8x64xf32> to vector<8x16xf32>
    %35 = vector.extract_strided_slice %31 {offsets = [0, 48], sizes = [8, 16], strides = [1, 1]} : vector<8x64xf32> to vector<8x16xf32>
    %36 = vector.shape_cast %32 : vector<8x16xf32> to vector<1x8x16xf32>
    %37 = vector.shape_cast %33 : vector<8x16xf32> to vector<1x8x16xf32>
    %38 = vector.shape_cast %34 : vector<8x16xf32> to vector<1x8x16xf32>
    %39 = vector.shape_cast %35 : vector<8x16xf32> to vector<1x8x16xf32>
    %40 = tpu.concatenate %36, %37, %38, %39 in 0 : vector<1x8x16xf32>, vector<1x8x16xf32>, vector<1x8x16xf32>, vector<1x8x16xf32> -> vector<4x8x16xf32>
    %41 = vector.extract_strided_slice %28 {offsets = [8, 0], sizes = [8, 64], strides = [1, 1]} : vector<16x64xf32> to vector<8x64xf32>
    %42 = vector.extract_strided_slice %41 {offsets = [0, 0], sizes = [8, 16], strides = [1, 1]} : vector<8x64xf32> to vector<8x16xf32>
    %43 = vector.extract_strided_slice %41 {offsets = [0, 16], sizes = [8, 16], strides = [1, 1]} : vector<8x64xf32> to vector<8x16xf32>
    %44 = vector.extract_strided_slice %41 {offsets = [0, 32], sizes = [8, 16], strides = [1, 1]} : vector<8x64xf32> to vector<8x16xf32>
    %45 = vector.extract_strided_slice %41 {offsets = [0, 48], sizes = [8, 16], strides = [1, 1]} : vector<8x64xf32> to vector<8x16xf32>
    %46 = vector.shape_cast %42 : vector<8x16xf32> to vector<1x8x16xf32>
    %47 = vector.shape_cast %43 : vector<8x16xf32> to vector<1x8x16xf32>
    %48 = vector.shape_cast %44 : vector<8x16xf32> to vector<1x8x16xf32>
    %49 = vector.shape_cast %45 : vector<8x16xf32> to vector<1x8x16xf32>
    %50 = tpu.concatenate %46, %47, %48, %49 in 0 : vector<1x8x16xf32>, vector<1x8x16xf32>, vector<1x8x16xf32>, vector<1x8x16xf32> -> vector<4x8x16xf32>
    %51 = vector.shape_cast %40 : vector<4x8x16xf32> to vector<1x4x8x16xf32>
    %52 = vector.shape_cast %50 : vector<4x8x16xf32> to vector<1x4x8x16xf32>
    %53 = tpu.concatenate %51, %52 in 0 : vector<1x4x8x16xf32>, vector<1x4x8x16xf32> -> vector<2x4x8x16xf32>
    %54 = vector.extract_strided_slice %29 {offsets = [0, 0], sizes = [8, 32], strides = [1, 1]} : vector<16x32xf32> to vector<8x32xf32>
    %55 = vector.extract_strided_slice %54 {offsets = [0, 0], sizes = [8, 16], strides = [1, 1]} : vector<8x32xf32> to vector<8x16xf32>
    %56 = vector.extract_strided_slice %54 {offsets = [0, 16], sizes = [8, 16], strides = [1, 1]} : vector<8x32xf32> to vector<8x16xf32>
    %57 = vector.shape_cast %55 : vector<8x16xf32> to vector<1x8x16xf32>
    %58 = vector.shape_cast %56 : vector<8x16xf32> to vector<1x8x16xf32>
    %59 = tpu.concatenate %57, %58 in 0 : vector<1x8x16xf32>, vector<1x8x16xf32> -> vector<2x8x16xf32>
    %60 = vector.extract_strided_slice %29 {offsets = [8, 0], sizes = [8, 32], strides = [1, 1]} : vector<16x32xf32> to vector<8x32xf32>
    %61 = vector.extract_strided_slice %60 {offsets = [0, 0], sizes = [8, 16], strides = [1, 1]} : vector<8x32xf32> to vector<8x16xf32>
    %62 = vector.extract_strided_slice %60 {offsets = [0, 16], sizes = [8, 16], strides = [1, 1]} : vector<8x32xf32> to vector<8x16xf32>
    %63 = vector.shape_cast %61 : vector<8x16xf32> to vector<1x8x16xf32>
    %64 = vector.shape_cast %62 : vector<8x16xf32> to vector<1x8x16xf32>
    %65 = tpu.concatenate %63, %64 in 0 : vector<1x8x16xf32>, vector<1x8x16xf32> -> vector<2x8x16xf32>
    %66 = vector.shape_cast %59 : vector<2x8x16xf32> to vector<1x2x8x16xf32>
    %67 = vector.shape_cast %65 : vector<2x8x16xf32> to vector<1x2x8x16xf32>
    %68 = tpu.concatenate %66, %67 in 0 : vector<1x2x8x16xf32>, vector<1x2x8x16xf32> -> vector<2x2x8x16xf32>
    %69 = vector.extract_strided_slice %30 {offsets = [0, 0], sizes = [8, 32], strides = [1, 1]} : vector<16x32xf32> to vector<8x32xf32>
    %70 = vector.extract_strided_slice %69 {offsets = [0, 0], sizes = [8, 16], strides = [1, 1]} : vector<8x32xf32> to vector<8x16xf32>
    %71 = vector.extract_strided_slice %69 {offsets = [0, 0], sizes = [8, 16], strides = [1, 1]} : vector<8x32xf32> to vector<8x16xf32>
    %72 = vector.extract_strided_slice %69 {offsets = [0, 16], sizes = [8, 16], strides = [1, 1]} : vector<8x32xf32> to vector<8x16xf32>
    %73 = vector.extract_strided_slice %69 {offsets = [0, 16], sizes = [8, 16], strides = [1, 1]} : vector<8x32xf32> to vector<8x16xf32>
    %74 = vector.shape_cast %70 : vector<8x16xf32> to vector<1x8x16xf32>
    %75 = vector.shape_cast %71 : vector<8x16xf32> to vector<1x8x16xf32>
    %76 = vector.shape_cast %72 : vector<8x16xf32> to vector<1x8x16xf32>
    %77 = vector.shape_cast %73 : vector<8x16xf32> to vector<1x8x16xf32>
    %78 = tpu.concatenate %74, %75, %76, %77 in 0 : vector<1x8x16xf32>, vector<1x8x16xf32>, vector<1x8x16xf32>, vector<1x8x16xf32> -> vector<4x8x16xf32>
    %79 = vector.extract_strided_slice %30 {offsets = [8, 0], sizes = [8, 32], strides = [1, 1]} : vector<16x32xf32> to vector<8x32xf32>
    %80 = vector.extract_strided_slice %79 {offsets = [0, 0], sizes = [8, 16], strides = [1, 1]} : vector<8x32xf32> to vector<8x16xf32>
    %81 = vector.extract_strided_slice %79 {offsets = [0, 0], sizes = [8, 16], strides = [1, 1]} : vector<8x32xf32> to vector<8x16xf32>
    %82 = vector.extract_strided_slice %79 {offsets = [0, 16], sizes = [8, 16], strides = [1, 1]} : vector<8x32xf32> to vector<8x16xf32>
    %83 = vector.extract_strided_slice %79 {offsets = [0, 16], sizes = [8, 16], strides = [1, 1]} : vector<8x32xf32> to vector<8x16xf32>
    %84 = vector.shape_cast %80 : vector<8x16xf32> to vector<1x8x16xf32>
    %85 = vector.shape_cast %81 : vector<8x16xf32> to vector<1x8x16xf32>
    %86 = vector.shape_cast %82 : vector<8x16xf32> to vector<1x8x16xf32>
    %87 = vector.shape_cast %83 : vector<8x16xf32> to vector<1x8x16xf32>
    %88 = tpu.concatenate %84, %85, %86, %87 in 0 : vector<1x8x16xf32>, vector<1x8x16xf32>, vector<1x8x16xf32>, vector<1x8x16xf32> -> vector<4x8x16xf32>
    %89 = vector.shape_cast %78 : vector<4x8x16xf32> to vector<1x4x8x16xf32>
    %90 = vector.shape_cast %88 : vector<4x8x16xf32> to vector<1x4x8x16xf32>
    %91 = tpu.concatenate %89, %90 in 0 : vector<1x4x8x16xf32>, vector<1x4x8x16xf32> -> vector<2x4x8x16xf32>
    %92 = vector.broadcast %7 : vector<2x1x8x16xf32> to vector<2x4x8x16xf32>
    %93 = arith.mulf %53, %92 : vector<2x4x8x16xf32>
    %94 = vector.extract_strided_slice %53 {offsets = [0, 0, 0, 8], sizes = [2, 4, 8, 8], strides = [1, 1, 1, 1]} : vector<2x4x8x16xf32> to vector<2x4x8x8xf32>
    %cst_24 = arith.constant 0.000000e+00 : f32
    %95 = vector.broadcast %cst_24 : f32 to vector<2x4x8x8xf32>
    %96 = arith.subf %95, %94 : vector<2x4x8x8xf32>
    %97 = vector.extract_strided_slice %53 {offsets = [0, 0, 0, 0], sizes = [2, 4, 8, 8], strides = [1, 1, 1, 1]} : vector<2x4x8x16xf32> to vector<2x4x8x8xf32>
    %98 = tpu.concatenate %96, %97 in 3 : vector<2x4x8x8xf32>, vector<2x4x8x8xf32> -> vector<2x4x8x16xf32>
    %99 = vector.broadcast %9 : vector<2x1x8x16xf32> to vector<2x4x8x16xf32>
    %100 = arith.mulf %98, %99 : vector<2x4x8x16xf32>
    %101 = arith.addf %93, %100 : vector<2x4x8x16xf32>
    %102 = vector.broadcast %7 : vector<2x1x8x16xf32> to vector<2x2x8x16xf32>
    %103 = arith.mulf %68, %102 : vector<2x2x8x16xf32>
    %104 = vector.extract_strided_slice %68 {offsets = [0, 0, 0, 8], sizes = [2, 2, 8, 8], strides = [1, 1, 1, 1]} : vector<2x2x8x16xf32> to vector<2x2x8x8xf32>
    %cst_25 = arith.constant 0.000000e+00 : f32
    %105 = vector.broadcast %cst_25 : f32 to vector<2x2x8x8xf32>
    %106 = arith.subf %105, %104 : vector<2x2x8x8xf32>
    %107 = vector.extract_strided_slice %68 {offsets = [0, 0, 0, 0], sizes = [2, 2, 8, 8], strides = [1, 1, 1, 1]} : vector<2x2x8x16xf32> to vector<2x2x8x8xf32>
    %108 = tpu.concatenate %106, %107 in 3 : vector<2x2x8x8xf32>, vector<2x2x8x8xf32> -> vector<2x2x8x16xf32>
    %109 = vector.broadcast %9 : vector<2x1x8x16xf32> to vector<2x2x8x16xf32>
    %110 = arith.mulf %108, %109 : vector<2x2x8x16xf32>
    %111 = arith.addf %103, %110 : vector<2x2x8x16xf32>
    %112 = vector.extract_strided_slice %111 {offsets = [0, 0, 0, 0], sizes = [2, 1, 8, 16], strides = [1, 1, 1, 1]} : vector<2x2x8x16xf32> to vector<2x1x8x16xf32>
    %113 = vector.extract_strided_slice %111 {offsets = [0, 0, 0, 0], sizes = [2, 1, 8, 16], strides = [1, 1, 1, 1]} : vector<2x2x8x16xf32> to vector<2x1x8x16xf32>
    %114 = vector.extract_strided_slice %111 {offsets = [0, 1, 0, 0], sizes = [2, 1, 8, 16], strides = [1, 1, 1, 1]} : vector<2x2x8x16xf32> to vector<2x1x8x16xf32>
    %115 = vector.extract_strided_slice %111 {offsets = [0, 1, 0, 0], sizes = [2, 1, 8, 16], strides = [1, 1, 1, 1]} : vector<2x2x8x16xf32> to vector<2x1x8x16xf32>
    %116 = tpu.concatenate %112, %113, %114, %115 in 1 : vector<2x1x8x16xf32>, vector<2x1x8x16xf32>, vector<2x1x8x16xf32>, vector<2x1x8x16xf32> -> vector<2x4x8x16xf32>
    %117 = vector.shape_cast %101 : vector<2x4x8x16xf32> to vector<8x8x16xf32>
    %118 = vector.shape_cast %116 : vector<2x4x8x16xf32> to vector<8x8x16xf32>
    %119 = vector.shape_cast %91 : vector<2x4x8x16xf32> to vector<8x8x16xf32>
    "tpu.trace_start"() <{level = 10 : i32, message = "gqd,gkd->gqk"}> : () -> ()
    %cst_26 = arith.constant dense<0.000000e+00> : vector<8x8x8xf32>
    %120 = tpu.matmul %117, %118, %cst_26 {dimension_numbers = #tpu.dot_dimension_numbers<[2], [2], [1], [1], [0, 0, 0, 1, 1, 1], [0], [0]>} : vector<8x8x16xf32>, vector<8x8x16xf32>, vector<8x8x8xf32> -> vector<8x8x8xf32>
    "tpu.trace_stop"() : () -> ()
    %121 = vector.shape_cast %120 : vector<8x8x8xf32> to vector<2x4x8x8xf32>
    %122 = vector.broadcast %5 : vector<2x1x8x8xf32> to vector<2x4x8x8xf32>
    %123 = arith.addf %121, %122 : vector<2x4x8x8xf32>
    %cst_27 = arith.constant dense<0xFF800000> : vector<2x4x8xf32>
    %124 = vector.multi_reduction <maximumf>, %123, %cst_27 [3] : vector<2x4x8x8xf32> to vector<2x4x8xf32>
    %125 = vector.shape_cast %124 : vector<2x4x8xf32> to vector<2x4x8x1xf32>
    %126 = vector.broadcast %125 : vector<2x4x8x1xf32> to vector<2x4x8x8xf32>
    %127 = arith.subf %123, %126 : vector<2x4x8x8xf32>
    %128 = math.exp %127 : vector<2x4x8x8xf32>
    %cst_28 = arith.constant dense<0.000000e+00> : vector<2x4x8xf32>
    %129 = vector.multi_reduction <add>, %128, %cst_28 [3] : vector<2x4x8x8xf32> to vector<2x4x8xf32>
    %130 = vector.shape_cast %129 : vector<2x4x8xf32> to vector<2x4x8x1xf32>
    %131 = vector.broadcast %130 : vector<2x4x8x1xf32> to vector<2x4x8x8xf32>
    %132 = arith.divf %128, %131 : vector<2x4x8x8xf32>
    %c0_29 = arith.constant 0 : index
    %c0_30 = arith.constant 0 : index
    %c0_31 = arith.constant 0 : index
    %c0_32 = arith.constant 0 : index
    %133 = vector.load %arg12[%c0_29, %c0_30, %c0_31, %c0_32] : memref<2x4x8x8xf32, #tpu.memory_space<vmem>>, vector<2x4x8x8xf32>
    tpu.vector_store %arg12[%c0_29, %c0_30, %c0_31, %c0_32], %132 {strides = array<i32>} : memref<2x4x8x8xf32, #tpu.memory_space<vmem>>, vector<2x4x8x8xf32>,
    %134 = vector.shape_cast %132 : vector<2x4x8x8xf32> to vector<8x8x8xf32>
    "tpu.trace_start"() <{level = 10 : i32, message = "gqk,gkd->gqd"}> : () -> ()
    %cst_33 = arith.constant dense<0.000000e+00> : vector<8x8x16xf32>
    %135 = tpu.matmul %134, %119, %cst_33 {dimension_numbers = #tpu.dot_dimension_numbers<[2], [1], [1], [2], [0, 0, 0, 1, 1, 2], [0], [0]>} : vector<8x8x8xf32>, vector<8x8x16xf32>, vector<8x8x16xf32> -> vector<8x8x16xf32>
    "tpu.trace_stop"() : () -> ()
    %136 = vector.shape_cast %135 : vector<8x8x16xf32> to vector<2x4x8x16xf32>
    %137 = vector.extract_strided_slice %136 {offsets = [0, 0, 0, 0], sizes = [1, 1, 8, 16], strides = [1, 1, 1, 1]} : vector<2x4x8x16xf32> to vector<1x1x8x16xf32>
    %138 = vector.shape_cast %137 : vector<1x1x8x16xf32> to vector<8x16xf32>
    %139 = vector.extract_strided_slice %136 {offsets = [0, 1, 0, 0], sizes = [1, 1, 8, 16], strides = [1, 1, 1, 1]} : vector<2x4x8x16xf32> to vector<1x1x8x16xf32>
    %140 = vector.shape_cast %139 : vector<1x1x8x16xf32> to vector<8x16xf32>
    %141 = vector.extract_strided_slice %136 {offsets = [0, 2, 0, 0], sizes = [1, 1, 8, 16], strides = [1, 1, 1, 1]} : vector<2x4x8x16xf32> to vector<1x1x8x16xf32>
    %142 = vector.shape_cast %141 : vector<1x1x8x16xf32> to vector<8x16xf32>
    %143 = vector.extract_strided_slice %136 {offsets = [0, 3, 0, 0], sizes = [1, 1, 8, 16], strides = [1, 1, 1, 1]} : vector<2x4x8x16xf32> to vector<1x1x8x16xf32>
    %144 = vector.shape_cast %143 : vector<1x1x8x16xf32> to vector<8x16xf32>
    %145 = tpu.concatenate %138, %140, %142, %144 in 1 : vector<8x16xf32>, vector<8x16xf32>, vector<8x16xf32>, vector<8x16xf32> -> vector<8x64xf32>
    %146 = vector.extract_strided_slice %136 {offsets = [1, 0, 0, 0], sizes = [1, 1, 8, 16], strides = [1, 1, 1, 1]} : vector<2x4x8x16xf32> to vector<1x1x8x16xf32>
    %147 = vector.shape_cast %146 : vector<1x1x8x16xf32> to vector<8x16xf32>
    %148 = vector.extract_strided_slice %136 {offsets = [1, 1, 0, 0], sizes = [1, 1, 8, 16], strides = [1, 1, 1, 1]} : vector<2x4x8x16xf32> to vector<1x1x8x16xf32>
    %149 = vector.shape_cast %148 : vector<1x1x8x16xf32> to vector<8x16xf32>
    %150 = vector.extract_strided_slice %136 {offsets = [1, 2, 0, 0], sizes = [1, 1, 8, 16], strides = [1, 1, 1, 1]} : vector<2x4x8x16xf32> to vector<1x1x8x16xf32>
    %151 = vector.shape_cast %150 : vector<1x1x8x16xf32> to vector<8x16xf32>
    %152 = vector.extract_strided_slice %136 {offsets = [1, 3, 0, 0], sizes = [1, 1, 8, 16], strides = [1, 1, 1, 1]} : vector<2x4x8x16xf32> to vector<1x1x8x16xf32>
    %153 = vector.shape_cast %152 : vector<1x1x8x16xf32> to vector<8x16xf32>
    %154 = tpu.concatenate %147, %149, %151, %153 in 1 : vector<8x16xf32>, vector<8x16xf32>, vector<8x16xf32>, vector<8x16xf32> -> vector<8x64xf32>
    %155 = tpu.concatenate %145, %154 in 0 : vector<8x64xf32>, vector<8x64xf32> -> vector<16x64xf32>
    %c0_34 = arith.constant 0 : index
    %c0_35 = arith.constant 0 : index
    %156 = vector.load %arg6[%c0_34, %c0_35] : memref<64x64xf32, #tpu.memory_space<vmem>>, vector<64x64xf32>
    %cst_36 = arith.constant dense<0.000000e+00> : vector<16x64xf32>
    %157 = tpu.matmul %155, %156, %cst_36 {dimension_numbers = #tpu.dot_dimension_numbers<[1], [0], [0], [1], [0, 0, 1, 1], [], []>} : vector<16x64xf32>, vector<64x64xf32>, vector<16x64xf32> -> vector<16x64xf32>
    %158 = arith.addf %4, %157 : vector<16x64xf32>
    %159 = arith.mulf %158, %158 : vector<16x64xf32>
    %cst_37 = arith.constant dense<0.000000e+00> : vector<16xf32>
    %160 = vector.multi_reduction <add>, %159, %cst_37 [1] : vector<16x64xf32> to vector<16xf32>
    %161 = vector.shape_cast %160 : vector<16xf32> to vector<16x1xf32>
    %cst_38 = arith.constant 6.400000e+01 : f32
    %162 = vector.broadcast %cst_38 : f32 to vector<16x1xf32>
    %163 = arith.divf %161, %162 : vector<16x1xf32>
    %cst_39 = arith.constant 9.99999997E-7 : f32
    %164 = vector.broadcast %cst_39 : f32 to vector<16x1xf32>
    %165 = arith.addf %163, %164 : vector<16x1xf32>
    %166 = math.rsqrt %165 : vector<16x1xf32>
    %167 = vector.broadcast %166 : vector<16x1xf32> to vector<16x64xf32>
    %168 = arith.mulf %158, %167 : vector<16x64xf32>
    %169 = vector.broadcast %11 : vector<1x64xf32> to vector<16x64xf32>
    %170 = arith.mulf %168, %169 : vector<16x64xf32>
    %c0_40 = arith.constant 0 : index
    %c0_41 = arith.constant 0 : index
    %171 = vector.load %arg7[%c0_40, %c0_41] : memref<64x256xf32, #tpu.memory_space<vmem>>, vector<64x256xf32>
    %cst_42 = arith.constant dense<0.000000e+00> : vector<16x256xf32>
    %172 = tpu.matmul %170, %171, %cst_42 {dimension_numbers = #tpu.dot_dimension_numbers<[1], [0], [0], [1], [0, 0, 1, 1], [], []>} : vector<16x64xf32>, vector<64x256xf32>, vector<16x256xf32> -> vector<16x256xf32>
    %173 = vector.extract_strided_slice %172 {offsets = [0, 0], sizes = [16, 128], strides = [1, 1]} : vector<16x256xf32> to vector<16x128xf32>
    %174 = vector.extract_strided_slice %172 {offsets = [0, 128], sizes = [16, 128], strides = [1, 1]} : vector<16x256xf32> to vector<16x128xf32>
    %175 = arith.negf %173 : vector<16x128xf32>
    %176 = math.exp %175 : vector<16x128xf32>
    %cst_43 = arith.constant 1.000000e+00 : f32
    %177 = vector.broadcast %cst_43 : f32 to vector<16x128xf32>
    %178 = arith.addf %177, %176 : vector<16x128xf32>
    %179 = arith.divf %177, %178 : vector<16x128xf32>
    %180 = arith.mulf %173, %179 : vector<16x128xf32>
    %181 = arith.mulf %180, %174 : vector<16x128xf32>
    %c0_44 = arith.constant 0 : index
    %c0_45 = arith.constant 0 : index
    %182 = vector.load %arg8[%c0_44, %c0_45] : memref<128x64xf32, #tpu.memory_space<vmem>>, vector<128x64xf32>
    %cst_46 = arith.constant dense<0.000000e+00> : vector<16x64xf32>
    %183 = tpu.matmul %181, %182, %cst_46 {dimension_numbers = #tpu.dot_dimension_numbers<[1], [0], [0], [1], [0, 0, 1, 1], [], []>} : vector<16x128xf32>, vector<128x64xf32>, vector<16x64xf32> -> vector<16x64xf32>
    %184 = arith.addf %158, %183 : vector<16x64xf32>
    %185 = vector.extract_strided_slice %184 {offsets = [0, 0], sizes = [8, 64], strides = [1, 1]} : vector<16x64xf32> to vector<8x64xf32>
    %c0_47 = arith.constant 0 : index
    %c0_48 = arith.constant 0 : index
    %c0_49 = arith.constant 0 : index
    %186 = vector.load %arg11[%c0_47, %c0_48, %c0_49] : memref<2x8x64xf32, #tpu.memory_space<vmem>>, vector<1x8x64xf32>
    %187 = vector.shape_cast %186 : vector<1x8x64xf32> to vector<8x64xf32>
    %188 = vector.shape_cast %185 : vector<8x64xf32> to vector<1x8x64xf32>
    tpu.vector_store %arg11[%c0_47, %c0_48, %c0_49], %188 {strides = array<i32>} : memref<2x8x64xf32, #tpu.memory_space<vmem>>, vector<1x8x64xf32>,
    %189 = vector.extract_strided_slice %184 {offsets = [8, 0], sizes = [8, 64], strides = [1, 1]} : vector<16x64xf32> to vector<8x64xf32>
    %c1_50 = arith.constant 1 : index
    %c0_51 = arith.constant 0 : index
    %c0_52 = arith.constant 0 : index
    %190 = vector.load %arg11[%c1_50, %c0_51, %c0_52] : memref<2x8x64xf32, #tpu.memory_space<vmem>>, vector<1x8x64xf32>
    %191 = vector.shape_cast %190 : vector<1x8x64xf32> to vector<8x64xf32>
    %192 = vector.shape_cast %189 : vector<8x64xf32> to vector<1x8x64xf32>
    tpu.vector_store %arg11[%c1_50, %c0_51, %c0_52], %192 {strides = array<i32>} : memref<2x8x64xf32, #tpu.memory_space<vmem>>, vector<1x8x64xf32>,
    return
  }
  func.func @transform_0(%arg0: i32) -> (i32, i32, i32) {
    %c0_i32 = arith.constant 0 : i32
    %c0_i32_0 = arith.constant 0 : i32
    %c0_i32_1 = arith.constant 0 : i32
    return %arg0, %c0_i32, %c0_i32_0 : i32, i32, i32
  }
  func.func @transform_1(%arg0: i32) -> (i32, i32, i32, i32) {
    %c0_i32 = arith.constant 0 : i32
    %c0_i32_0 = arith.constant 0 : i32
    %c0_i32_1 = arith.constant 0 : i32
    %c0_i32_2 = arith.constant 0 : i32
    return %arg0, %c0_i32, %c0_i32_0, %c0_i32_1 : i32, i32, i32, i32
  }
  func.func @transform_2(%arg0: i32) -> (i32, i32, i32) {
    %c0_i32 = arith.constant 0 : i32
    %c0_i32_0 = arith.constant 0 : i32
    %c0_i32_1 = arith.constant 0 : i32
    return %arg0, %c0_i32, %c0_i32_0 : i32, i32, i32
  }
  func.func @transform_3(%arg0: i32) -> (i32, i32, i32) {
    %c0_i32 = arith.constant 0 : i32
    %c0_i32_0 = arith.constant 0 : i32
    %c0_i32_1 = arith.constant 0 : i32
    return %arg0, %c0_i32, %c0_i32_0 : i32, i32, i32
  }
  func.func @transform_4(%arg0: i32) -> (i32, i32) {
    %c0_i32 = arith.constant 0 : i32
    %c0_i32_0 = arith.constant 0 : i32
    %c0_i32_1 = arith.constant 0 : i32
    return %c0_i32, %c0_i32_0 : i32, i32
  }
  func.func @transform_5(%arg0: i32) -> (i32, i32) {
    %c0_i32 = arith.constant 0 : i32
    %c0_i32_0 = arith.constant 0 : i32
    %c0_i32_1 = arith.constant 0 : i32
    return %c0_i32, %c0_i32_0 : i32, i32
  }
  func.func @transform_6(%arg0: i32) -> (i32, i32) {
    %c0_i32 = arith.constant 0 : i32
    %c0_i32_0 = arith.constant 0 : i32
    %c0_i32_1 = arith.constant 0 : i32
    return %c0_i32, %c0_i32_0 : i32, i32
  }
  func.func @transform_7(%arg0: i32) -> (i32, i32) {
    %c0_i32 = arith.constant 0 : i32
    %c0_i32_0 = arith.constant 0 : i32
    %c0_i32_1 = arith.constant 0 : i32
    return %c0_i32, %c0_i32_0 : i32, i32
  }
  func.func @transform_8(%arg0: i32) -> (i32, i32) {
    %c0_i32 = arith.constant 0 : i32
    %c0_i32_0 = arith.constant 0 : i32
    %c0_i32_1 = arith.constant 0 : i32
    return %c0_i32, %c0_i32_0 : i32, i32
  }
  func.func @transform_9(%arg0: i32) -> (i32, i32) {
    %c0_i32 = arith.constant 0 : i32
    %c0_i32_0 = arith.constant 0 : i32
    %c0_i32_1 = arith.constant 0 : i32
    return %c0_i32, %c0_i32_0 : i32, i32
  }
  func.func @transform_10(%arg0: i32) -> (i32, i32, i32) {
    %c0_i32 = arith.constant 0 : i32
    %c0_i32_0 = arith.constant 0 : i32
    %c0_i32_1 = arith.constant 0 : i32
    return %arg0, %c0_i32, %c0_i32_0 : i32, i32, i32
  }
  func.func @transform_11(%arg0: i32) -> (i32, i32, i32, i32) {
    %c0_i32 = arith.constant 0 : i32
    %c0_i32_0 = arith.constant 0 : i32
    %c0_i32_1 = arith.constant 0 : i32
    %c0_i32_2 = arith.constant 0 : i32
    return %arg0, %c0_i32, %c0_i32_0, %c0_i32_1 : i32, i32, i32, i32
  }
}

</mosaic_0001>

<bundles_post_ra>
// kernel: tpu_custom_call.1
= control target key start
LH: loop header
LB: loop body
LE: loop exit
PB: predicated region body
PF: predicated region fallthrough
CT: control target
= control target key end

     0   :  { %17 = vsyncpa [#allocation3], 0  ;;  %s3263_s0 = inlined_call_operand.vmem [shape: f32[2,8,64], index: 0, kind: input, shape index: {}]   ;;  %s3264_s1 = inlined_call_operand.hbm [shape: f32[2,1,8,8], index: 1, kind: input, shape index: {}]   ;;  %s3265_s2 = inlined_call_operand.hbm [shape: f32[2,8,16], index: 2, kind: input, shape index: {}]   ;;  %s3266_s3 = inlined_call_operand.hbm [shape: f32[2,8,16], index: 3, kind: input, shape index: {}]   ;;  %s3267_s4 = inlined_call_operand.vmem [shape: f32[64,128], index: 4, kind: input, shape index: {}]   ;;  %s3268_s5 = inlined_call_operand.hbm [shape: f32[64,64], index: 5, kind: input, shape index: {}]   ;;  %s3269_s6 = inlined_call_operand.vmem [shape: f32[64,256], index: 6, kind: input, shape index: {}]   ;;  %s3270_s7 = inlined_call_operand.vmem [shape: f32[128,64], index: 7, kind: input, shape index: {}]   ;;  %s3271_s8 = inlined_call_operand.vmem [shape: f32[1,64], index: 8, kind: input, shape index: {}]   ;;  %s3272_s9 = inlined_call_operand.vmem [shape: f32[1,64], index: 9, kind: input, shape index: {}]   ;;  %s3273_s10 = inlined_call_operand.hbm [shape: f32[2,8,64], index: 10, kind: output, shape index: {0}]   ;;  %s3274_s11 = inlined_call_operand.hbm [shape: f32[2,4,8,8], index: 11, kind: output, shape index: {1}]  }
   0x1   :  { %18 = vsyncpa [#allocation6], 0 }
   0x2   :  { %19 = vsyncpa [#allocation9], 0 }
   0x3   :  { %20 = vsyncpa [#allocation4], 0 }
   0x4   :  { %21 = vsyncpa [#allocation12], 0  ;;  %s2665_s17 = smov [#allocation5]   ;;  %s2666_s19 = smov [#allocation2]  }
   0x5   :  { %s41_s18 = sshll.u32 %s2665_s17, 4  ;;  %s29_s20 = sshll.u32 %s2666_s19, 4  ;;  %s42_s18 = int_to_ptr.vmem [resolvable:$true] %s41_s18  ;;  %s2745_s20 = int_to_ptr.vmem [resolvable:$true] %s29_s20 }
   0x6   :  { %s2523_s23 = scalar_lea.hbm %s3265_s2, 256 }
   0x7   :  { %p2524_p0 = scmp.ne.s32.totalorder %s3265_s2, %s2523_s23  ;;  %p2527_p1 = scmp.lt.u32.totalorder %s2523_s23, %s3265_s2 }
   0x9   :  { %p2529_p2 = pnand %p2527_p1, %p2524_p0 }
   0xb   :  { %2532 = shalt.err (!%p2529_p2)
}
   0xc   :  { %s2533_s28 = scalar_lea.vmem %s42_s18, 256  ;;  %p2538_p4 = scmp.lt.s32.totalorder %s42_s18, %s42_s18 }
   0xd   :  { %p2534_p3 = scmp.ne.s32.totalorder %s42_s18, %s2533_s28  ;;  %p2539_p5 = scmp.lt.s32.totalorder %s2533_s28, %s2533_s28 }
   0xf   :  { %p2540_p6 = por %p2539_p5, %p2538_p4 }
  0x11   :  { %p2541_p7 = pnand %p2540_p6, %p2534_p3 }
  0x13   :  { %2544 = shalt.err (!%p2541_p7)
}
  0x14   :  { %s2667_s29 = smov 128   ;;  %s2668_s30 = smov 8  }
  0x15   :  { %47 = dma.hbm_to_vmem [thread:$0]  %s3265_s2, 256, %s42_s18, [#allocation6], %s2667_s29, %s2667_s29, %s2668_s30  }
  0x16   :  { %s2545_s16 = scalar_lea.hbm %s3264_s1, 256 }
  0x17   :  { %p2546_p8 = scmp.ne.s32.totalorder %s3264_s1, %s2545_s16  ;;  %p2549_p9 = scmp.lt.u32.totalorder %s2545_s16, %s3264_s1 }
  0x19   :  { %p2551_p10 = pnand %p2549_p9, %p2546_p8 }
  0x1b   :  { %2554 = shalt.err (!%p2551_p10)
}
  0x1c   :  { %s2555_s23 = scalar_lea.vmem %s2745_s20, 256  ;;  %p2560_p12 = scmp.lt.s32.totalorder %s2745_s20, %s2745_s20 }
  0x1d   :  { %p2556_p11 = scmp.ne.s32.totalorder %s2745_s20, %s2555_s23  ;;  %p2561_p13 = scmp.lt.s32.totalorder %s2555_s23, %s2555_s23 }
  0x1f   :  { %p2562_p0 = por %p2561_p13, %p2560_p12 }
  0x21   :  { %p2563_p1 = pnand %p2562_p0, %p2556_p11 }
  0x23   :  { %2566 = shalt.err (!%p2563_p1)
}
  0x24   :  { %35 = dma.hbm_to_vmem [thread:$0]  %s3264_s1, 256, %s2745_s20, [#allocation3], %s2667_s29, %s2667_s29, %s2668_s30  }
  0x25   :  { %s2669_s24 = smov [#allocation7]   ;;  %s2670_s26 = smov [#allocation8]  }
  0x26   :  { %s53_s25 = sshll.u32 %s2669_s24, 4  ;;  %s67_s27 = sshll.u32 %s2670_s26, 4  ;;  %s54_s25 = int_to_ptr.vmem [resolvable:$true] %s53_s25  ;;  %s2782_s27 = int_to_ptr.vmem [resolvable:$true] %s67_s27 }
  0x27   :  { %s2567_s13 = scalar_lea.hbm %s3266_s3, 256 }
  0x28   :  { %p2568_p2 = scmp.ne.s32.totalorder %s3266_s3, %s2567_s13  ;;  %p2571_p3 = scmp.lt.u32.totalorder %s2567_s13, %s3266_s3 }
  0x2a   :  { %p2573_p4 = pnand %p2571_p3, %p2568_p2 }
  0x2c   :  { %2576 = shalt.err (!%p2573_p4)
}
  0x2d   :  { %s2577_s1 = scalar_lea.vmem %s54_s25, 256  ;;  %p2582_p6 = scmp.lt.s32.totalorder %s54_s25, %s54_s25 }
  0x2e   :  { %p2578_p5 = scmp.ne.s32.totalorder %s54_s25, %s2577_s1  ;;  %p2583_p7 = scmp.lt.s32.totalorder %s2577_s1, %s2577_s1 }
  0x30   :  { %p2584_p8 = por %p2583_p7, %p2582_p6 }
  0x32   :  { %p2585_p9 = pnand %p2584_p8, %p2578_p5 }
  0x34   :  { %2588 = shalt.err (!%p2585_p9)
}
  0x35   :  { %59 = dma.hbm_to_vmem [thread:$0]  %s3266_s3, 256, %s54_s25, [#allocation6], %s2667_s29, %s2667_s29, %s2668_s30  }
  0x36   :  { %s2589_s23 = scalar_lea.hbm %s3268_s5, 1024 }
  0x37   :  { %p2590_p10 = scmp.ne.s32.totalorder %s3268_s5, %s2589_s23  ;;  %p2593_p11 = scmp.lt.u32.totalorder %s2589_s23, %s3268_s5 }
  0x39   :  { %p2595_p12 = pnand %p2593_p11, %p2590_p10 }
  0x3b   :  { %2598 = shalt.err (!%p2595_p12)
}
  0x3c   :  { %s2599_s28 = scalar_lea.vmem %s2782_s27, 1024  ;;  %p2604_p0 = scmp.lt.s32.totalorder %s2782_s27, %s2782_s27 }
  0x3d   :  { %p2600_p13 = scmp.ne.s32.totalorder %s2782_s27, %s2599_s28  ;;  %p2605_p1 = scmp.lt.s32.totalorder %s2599_s28, %s2599_s28 }
  0x3f   :  { %p2606_p2 = por %p2605_p1, %p2604_p0 }
  0x41   :  { %p2607_p3 = pnand %p2606_p2, %p2600_p13 }
  0x43   :  { %2610 = shalt.err (!%p2607_p3)
}
  0x44   :  { %73 = dma.hbm_to_vmem [thread:$0]  %s3268_s5, 1024, %s2782_s27, [#allocation9], %s2667_s29, %s2667_s29, %s2668_s30  }
  0x45   :  { %2655 = dma.done.wait [#allocation3], 256  }
  0x46   :  { %2656 = vsyncadd [#allocation3], 4294967040 }
  0x47   :  { %2657 = dma.done.wait [#allocation6], 512  }
  0x48   :  { %2658 = vsyncadd [#allocation6], 4294966784 }
  0x49   :  { %2659 = dma.done.wait [#allocation9], 1024  }
  0x4a   :  { %2660 = vsyncadd [#allocation9], 4294966272  ;;  %v2822_v0 = vld [vmem:[%s3263_s0] sm:$0xff]  ;;  %vm107_vm0 = vcmask 523264   ;;  %v2827_v1 = vld [vmem:[%s3263_s0 + $0x8] sm:$0xff]  ;;  %s2673_s12 = smov 72  }
  0x4b   :  { %v105_v2 = vmul.f32 %v2822_v0, %v2822_v0  ;;  %v106_v3 = vmul.f32 %v2827_v1, %v2827_v1  ;;  %v131_v6 = vld [vmem:[%s3267_s4] sm:$0xff]  ;;  %v132_v7 = vld [vmem:[%s3267_s4 + $0x8] sm:$0xff]  ;;  %v133_v9 = vld [vmem:[%s3267_s4 + $0x10] sm:$0xff]  ;;  %vm322_vm1 = vcmask 64512   ;;  %s2674_s13 = smov 64   ;;  %s2675_s14 = smov 96  }
  0x4c   :  { %v2375_v8 = vpack.c.bf16 %v132_v7, %v131_v6  ;;  %v134_v10 = vld [vmem:[%s3267_s4 + $0x18] sm:$0xff]  ;;  %v135_v11 = vld [vmem:[%s3267_s4 + $0x20] sm:$0xff]  ;;  %v136_v13 = vld [vmem:[%s3267_s4 + $0x28] sm:$0xff]  ;;  %s2676_s15 = smov 80   ;;  %s2677_s5 = smov 120   ;;  %vm2679_vm2 = vmmov 0  }
  0x4d   :  { %v108_v4 = vsel %vm107_vm0, %v105_v2, 0.0  ;;  %v111_v5 = vsel %vm107_vm0, %v106_v3, 0.0  ;;  %v2379_v12 = vpack.c.bf16 %v134_v10, %v133_v9  ;;  %v2383_v14 = vpack.c.bf16 %v136_v13, %v135_v11  ;;  %v137_v15 = vld [vmem:[%s3267_s4 + $0x30] sm:$0xff]  ;;  %v138_v16 = vld [vmem:[%s3267_s4 + $0x38] sm:$0xff]  ;;  %v2118_v25 = vld [vmem:[%s3271_s8] ss:$0 sm:$0xff] }
  0x4e   :  { %109 = vadd.xlane.f32.xlu0 %v108_v4  ;;  %2376 = vmatprep.subr.bf16.mxu1 %v2375_v8  ;;  %v2387_v17 = vpack.c.bf16 %v138_v16, %v137_v15  ;;  %s2671_s4 = smov 112   ;;  %s2672_s8 = smov 56   ;;  %v2883_v37 = vld [vmem:[#allocation7] sm:$0xff]  ;;  %v2896_v45 = vld [vmem:[#allocation5] sm:$0xff]  ;;  %v2911_v52 = vld [vmem:[#allocation7 + $0x8] sm:$0xff]  ;;  %vm422_vm3 = vcmask 130048  }
  0x4f   :  { %2378 = vmatpush3.bf16.msra.mxu1 %v2375_v8  ;;  %v2913_v53 = vld [vmem:[#allocation5 + $0x8] sm:$0xff]  ;;  %s2680_s27 = smov 32   ;;  %s2681_s16 = smov 16   ;;  %vm1737_vm4 = vcmask 261120   ;;  %vm1739_vm5 = vcmask 392192  }
  0x50   :  { %2380 = vmatprep.subr.bf16.mxu1 %v2379_v12  ;;  %s2682_s17 = smov 48  }
  0x52   :  { %112 = vadd.xlane.f32.xlu0 %v111_v5  ;;  %v2678_v5 = vmov 0.0  }
  0x53   :  { %2382 = vmatpush3.bf16.msra.mxu1 %v2379_v12  ;;  %2261 = vmatprep.subr.mxu0 %v2678_v5 }
  0x54   :  { %2384 = vmatprep.subr.bf16.mxu1 %v2383_v14  ;;  %2263 = vmatprep.mubr.msk.f32.mxu0 %vm2679_vm2, %v2678_v5 }
  0x57   :  { %2386 = vmatpush3.bf16.msra.mxu1 %v2383_v14 }
  0x58   :  { %2388 = vmatprep.subr.bf16.mxu1 %v2387_v17 }
  0x5b   :  { %2390 = vmatpush3.bf16.msra.mxu1 %v2387_v17 }
  0x5c   :  { %2241 = vmatprep.subr.mxu1 %v2678_v5 }
  0xdb   :  { %v110_v18 = vpop.xlane.xlu0 %109 }
  0xdc   :  { %v115_v19 = vmul.f32 0.015625, %v110_v18 }
  0xde   :  { %v117_v20 = vadd.f32 1e-06, %v115_v19 }
  0xdf   :  { %v113_v21 = vpop.xlane.xlu0 %112 }
  0xe0   :  { %2475 = vrsqrt.f32 %v117_v20  ;;  %v116_v22 = vmul.f32 0.015625, %v113_v21 }
  0xe2   :  { %v118_v23 = vadd.f32 1e-06, %v116_v22 }
  0xe4   :  { %2477 = vrsqrt.f32 %v118_v23 }
  0xea   :  { %v2476_v24 = vpop.eup %2475 }
  0xeb   :  { %v121_v26 = vmul.f32 %v2476_v24, %v2822_v0 }
  0xed   :  { %v129_v27 = vmul.f32 %v2118_v25, %v121_v26 }
  0xee   :  { %v2478_v28 = vpop.eup %2477 }
  0xef   :  { %v122_v29 = vmul.f32 %v2478_v28, %v2827_v1  ;;  %2238 = vmatprep.mubr.msk.f32.mxu1 %vm107_vm0, %v129_v27 }
  0xf1   :  { %v130_v30 = vmul.f32 %v2118_v25, %v122_v29 }
  0xf3   :  { %2239 = vmatmul.mubr.msk.f32.vlgmr.msra.gmra.mrb[0].mxu1 %vm107_vm0, %v130_v30 }
  0xf4   :  { %2243 = vmatprep.mubr.msk.f32.mxu1 %vm2679_vm2, %v2678_v5 }
 0x1c6   :  { %v2866_v31 = vpop.f32.mrb[0].mxu1 }
 0x1c7   :  { %v2868_v32 = vpop.f32.mrb[1].mxu1  ;;  %v361_v38 = vsub.f32 0.0, %v2866_v31  ;;  %v2901_v46 = vmul.f32 0.25, %v2866_v31 }
 0x1c8   :  { %243 = vrot.lane.b32.xlu1 %v2868_v32, %s2671_s4  ;;  %v359_v33 = vsub.f32 0.0, %v2868_v32  ;;  %v2891_v43 = vmul.f32 0.25, %v2868_v32 }
 0x1c9   :  { %v262_v11 = vsub.f32 0.0, %v2901_v46 }
 0x1ca   :  { %367 = vrot.lane.b32.xlu0 %v359_v33, %s2672_s8  ;;  %v258_v63 = vsub.f32 0.0, %v2891_v43 }
 0x1cc   :  { %247 = vrot.lane.b32.xlu1 %v2866_v31, %s2671_s4 }
 0x1d0   :  { %379 = vrot.lane.b32.xlu1 %v2868_v32, %s2673_s12 }
 0x23a   :  { %v2876_v34 = vpop.permute.xlu1 %243 }
 0x23b   :  { %381 = vrot.lane.b32.xlu1 %v2876_v34, %s2673_s12  ;;  %v360_v35 = vsub.f32 0.0, %v2876_v34 }
 0x23c   :  { %v368_v39 = vpop.permute.xlu0 %367 }
 0x23e   :  { %v2880_v36 = vpop.permute.xlu1 %247 }
 0x23f   :  { %369 = vrot.lane.b32.xlu1 %v360_v35, %s2672_s8  ;;  %385 = vrot.lane.b32.xlu0 %v2880_v36, %s2673_s12  ;;  %v362_v44 = vsub.f32 0.0, %v2880_v36 }
 0x242   :  { %v380_v40 = vpop.permute.xlu1 %379 }
 0x243   :  { %v391_v41 = vsel %vm322_vm1, %v368_v39, %v380_v40  ;;  %371 = vrot.lane.b32.xlu1 %v361_v38, %s2672_s8 }
 0x244   :  { %v395_v42 = vmul.f32 %v391_v41, %v2883_v37 }
 0x246   :  { %403 = vrot.lane.b32.xlu0 %v395_v42, %s2674_s13 }
 0x247   :  { %383 = vrot.lane.b32.xlu1 %v2866_v31, %s2673_s12 }
 0x24a   :  { %226 = vrot.lane.b32.xlu0 %v2891_v43, %s2675_s14 }
 0x24b   :  { %373 = vrot.lane.b32.xlu1 %v362_v44, %s2672_s8 }
 0x24e   :  { %229 = vrot.lane.b32.xlu0 %v2891_v43, %s2676_s15 }
 0x24f   :  { %349 = vrot.lane.b32.xlu1 %v2896_v45, %s2674_s13 }
 0x252   :  { %233 = vrot.lane.b32.xlu0 %v2901_v46, %s2671_s4 }
 0x253   :  { %223 = vrot.lane.b32.xlu1 %v2891_v43, %s2671_s4 }
 0x256   :  { %236 = vrot.lane.b32.xlu0 %v2901_v46, %s2675_s14 }
 0x2ad   :  { %v382_v47 = vpop.permute.xlu1 %381 }
 0x2b1   :  { %v370_v48 = vpop.permute.xlu1 %369  ;;  %v386_v57 = vpop.permute.xlu0 %385 }
 0x2b2   :  { %v392_v49 = vsel %vm322_vm1, %v370_v48, %v382_v47 }
 0x2b3   :  { %v396_v50 = vmul.f32 %v392_v49, %v2883_v37 }
 0x2b5   :  { %v372_v51 = vpop.permute.xlu1 %371  ;;  %405 = vrot.lane.b32.xlu1 %v396_v50, %s2674_s13 }
 0x2b8   :  { %v404_v61 = vpop.permute.xlu0 %403 }
 0x2b9   :  { %v384_v54 = vpop.permute.xlu1 %383  ;;  %351 = vrot.lane.b32.xlu1 %v2913_v53, %s2674_s13 }
 0x2ba   :  { %v393_v55 = vsel %vm322_vm1, %v372_v51, %v384_v54 }
 0x2bb   :  { %v397_v56 = vmul.f32 %v393_v55, %v2911_v52 }
 0x2bc   :  { %v227_v3 = vpop.permute.xlu0 %226 }
 0x2bd   :  { %v374_v58 = vpop.permute.xlu1 %373  ;;  %407 = vrot.lane.b32.xlu1 %v397_v56, %s2674_s13  ;;  %v260_v6 = vsub.f32 0.0, %v227_v3  ;;  %v252_v40 = vmul.f32 %v227_v3, %v2896_v45  ;;  %v250_v56 = vmul.f32 %v2891_v43, %v2896_v45 }
 0x2be   :  { %v394_v59 = vsel %vm322_vm1, %v374_v58, %v386_v57 }
 0x2bf   :  { %v398_v60 = vmul.f32 %v394_v59, %v2911_v52 }
 0x2c0   :  { %v230_v7 = vpop.permute.xlu0 %229 }
 0x2c1   :  { %v350_v62 = vpop.permute.xlu1 %349  ;;  %409 = vrot.lane.b32.xlu0 %v398_v60, %s2674_s13  ;;  %239 = vrot.lane.b32.xlu1 %v2901_v46, %s2676_s15  ;;  %v261_v8 = vsub.f32 0.0, %v230_v7  ;;  %v253_v50 = vmul.f32 %v230_v7, %v2896_v45 }
 0x2c2   :  { %v355_v9 = vmul.f32 %v350_v62, %v2868_v32  ;;  %v356_v14 = vmul.f32 %v350_v62, %v2876_v34 }
 0x2c4   :  { %v415_v10 = vadd.f32 %v404_v61, %v355_v9  ;;  %v2949_v12 = vpop.permute.xlu0 %233  ;;  %v254_v9 = vmul.f32 %v2901_v46, %v2913_v53 }
 0x2c5   :  { %298 = vrot.lane.b32.xlu0 %v2891_v43, %s2668_s30  ;;  %v2927_v2 = vpop.permute.xlu1 %223  ;;  %274 = vrot.lane.b32.xlu1 %v258_v63, %s2677_s5  ;;  %v263_v13 = vsub.f32 0.0, %v2949_v12 }
 0x2c6   :  { %v259_v4 = vsub.f32 0.0, %v2927_v2  ;;  %v251_v61 = vmul.f32 %v2927_v2, %v2896_v45 }
 0x2c8   :  { %v2957_v17 = vpop.permute.xlu0 %236 }
 0x2c9   :  { %276 = vrot.lane.b32.xlu0 %v259_v4, %s2677_s5  ;;  %300 = vrot.lane.b32.xlu1 %v2927_v2, %s2668_s30  ;;  %v264_v19 = vsub.f32 0.0, %v2957_v17 }
 0x2cd   :  { %278 = vrot.lane.b32.xlu0 %v260_v6, %s2677_s5  ;;  %302 = vrot.lane.b32.xlu1 %v227_v3, %s2668_s30 }
 0x2d1   :  { %304 = vrot.lane.b32.xlu0 %v230_v7, %s2668_s30  ;;  %280 = vrot.lane.b32.xlu1 %v261_v8, %s2677_s5  ;;  %v255_v8 = vmul.f32 %v2949_v12, %v2913_v53 }
 0x2d5   :  { %306 = vrot.lane.b32.xlu0 %v2901_v46, %s2668_s30  ;;  %420 = vrot.lane.b32.xlu1 %v415_v10, %s2674_s13 }
 0x2d9   :  { %308 = vrot.lane.b32.xlu0 %v2949_v12, %s2668_s30  ;;  %282 = vrot.lane.b32.xlu1 %v262_v11, %s2677_s5 }
 0x2dd   :  { %284 = vrot.lane.b32.xlu1 %v263_v13, %s2677_s5 }
 0x327   :  { %v406_v15 = vpop.permute.xlu1 %405 }
 0x328   :  { %v416_v16 = vadd.f32 %v406_v15, %v356_v14 }
 0x32a   :  { %572 = vrot.lane.b32.xlu0 %v416_v16, %s2674_s13 }
 0x32b   :  { %v352_v18 = vpop.permute.xlu1 %351 }
 0x32c   :  { %v357_v20 = vmul.f32 %v2866_v31, %v352_v18  ;;  %v358_v26 = vmul.f32 %v352_v18, %v2880_v36  ;;  %v256_v18 = vmul.f32 %v2957_v17, %v2913_v53 }
 0x32e   :  { %286 = vrot.lane.b32.xlu0 %v264_v19, %s2677_s5 }
 0x32f   :  { %v408_v21 = vpop.permute.xlu1 %407 }
 0x330   :  { %v417_v22 = vadd.f32 %v408_v21, %v357_v20 }
 0x332   :  { %723 = vrot.lane.b32.xlu1 %v417_v22, %s2674_s13 }
 0x333   :  { %v410_v23 = vpop.permute.xlu0 %409  ;;  %v2964_v24 = vpop.permute.xlu1 %239 }
 0x334   :  { %v265_v25 = vsub.f32 0.0, %v2964_v24  ;;  %v418_v29 = vadd.f32 %v410_v23, %v358_v26  ;;  %v257_v22 = vmul.f32 %v2964_v24, %v2913_v53 }
 0x336   :  { %288 = vrot.lane.b32.xlu0 %v265_v25, %s2677_s5  ;;  %310 = vrot.lane.b32.xlu1 %v2957_v17, %s2668_s30  ;;  %v97_v17 = vld [vmem:[#allocation2] sm:$0xff] }
 0x337   :  { %v299_v27 = vpop.permute.xlu0 %298  ;;  %v275_v28 = vpop.permute.xlu1 %274 }
 0x338   :  { %v323_v42 = vsel %vm322_vm1, %v275_v28, %v299_v27 }
 0x339   :  { %v331_v51 = vmul.f32 %v323_v42, %v2883_v37 }
 0x33a   :  { %874 = vrot.lane.b32.xlu0 %v418_v29, %s2674_s13  ;;  %312 = vrot.lane.b32.xlu1 %v2964_v24, %s2668_s30 }
 0x33b   :  { %v277_v30 = vpop.permute.xlu0 %276  ;;  %v301_v33 = vpop.permute.xlu1 %300  ;;  %v339_v59 = vadd.f32 %v331_v51, %v250_v56 }
 0x33c   :  { %v324_v55 = vsel %vm322_vm1, %v277_v30, %v301_v33 }
 0x33d   :  { %v332_v60 = vmul.f32 %v324_v55, %v2883_v37 }
 0x33f   :  { %v279_v35 = vpop.permute.xlu0 %278  ;;  %v303_v38 = vpop.permute.xlu1 %302  ;;  %v340_v43 = vadd.f32 %v332_v60, %v251_v61 }
 0x340   :  { %v325_v39 = vsel %vm322_vm1, %v279_v35, %v303_v38 }
 0x341   :  { %v333_v41 = vmul.f32 %v325_v39, %v2883_v37 }
 0x343   :  { %v341_v44 = vadd.f32 %v333_v41, %v252_v40  ;;  %v305_v47 = vpop.permute.xlu0 %304  ;;  %v281_v48 = vpop.permute.xlu1 %280 }
 0x344   :  { %v326_v49 = vsel %vm322_vm1, %v281_v48, %v305_v47  ;;  %v98_v47 = vld [vmem:[#allocation2 + $0x8] sm:$0xff] }
 0x345   :  { %v334_v54 = vmul.f32 %v326_v49, %v2883_v37 }
 0x347   :  { %v342_v57 = vadd.f32 %v334_v54, %v253_v50  ;;  %v421_v58 = vpop.permute.xlu1 %420  ;;  %v307_v37 = vpop.permute.xlu0 %306 }
 0x348   :  { %2242 = vmatpush3.xpose.msk.msra.mxu1 %vm422_vm3, %v421_v58 }
 0x349   :  { %2246 = vmatprep.subr.mxu1 %v2678_v5 }
 0x34b   :  { %2244 = vmatmul.mubr.msk.f32.vlgmr.msra.gmra.mrb[2].mxu1 %vm422_vm3, %v339_v59  ;;  %v283_v62 = vpop.permute.xlu1 %282  ;;  %v309_v63 = vpop.permute.xlu0 %308 }
 0x34c   :  { %2247 = vmatpush3.xpose.msk.msra.mxu1 %vm422_vm3, %v421_v58  ;;  %2248 = vmatprep.mubr.msk.f32.mxu1 %vm2679_vm2, %v2678_v5  ;;  %v327_v2 = vsel %vm322_vm1, %v283_v62, %v307_v37 }
 0x34d   :  { %2251 = vmatprep.subr.mxu1 %v2678_v5  ;;  %v335_v6 = vmul.f32 %v327_v2, %v2911_v52 }
 0x34f   :  { %2249 = vmatmul.mubr.msk.f32.vlgmr.msra.gmra.mrb[4].mxu1 %vm422_vm3, %v340_v43  ;;  %v285_v3 = vpop.permute.xlu1 %284  ;;  %v343_v13 = vadd.f32 %v335_v6, %v254_v9 }
 0x350   :  { %2253 = vmatprep.mubr.msk.f32.mxu1 %vm2679_vm2, %v2678_v5  ;;  %v328_v4 = vsel %vm322_vm1, %v285_v3, %v309_v63 }
 0x351   :  { %v336_v7 = vmul.f32 %v328_v4, %v2911_v52 }
 0x353   :  { %v344_v14 = vadd.f32 %v336_v7, %v255_v8 }
 0x39c   :  { %v573_v45 = vpop.permute.xlu0 %572 }
 0x39d   :  { %2252 = vmatpush3.xpose.msk.msra.mxu1 %vm422_vm3, %v573_v45 }
 0x39e   :  { %2256 = vmatprep.subr.mxu1 %v2678_v5 }
 0x3a0   :  { %2254 = vmatmul.mubr.msk.f32.vlgmr.msra.gmra.mrb[6].mxu1 %vm422_vm3, %v341_v44  ;;  %v287_v10 = vpop.permute.xlu0 %286 }
 0x3a1   :  { %2257 = vmatpush3.xpose.msk.msra.mxu1 %vm422_vm3, %v573_v45  ;;  %2258 = vmatprep.mubr.msk.f32.mxu1 %vm2679_vm2, %v2678_v5 }
 0x3a2   :  { %2266 = vmatprep.subr.mxu1 %v2678_v5 }
 0x3a4   :  { %v724_v11 = vpop.permute.xlu1 %723  ;;  %2259 = vmatmul.mubr.msk.f32.vlgmr.msra.gmra.mrb[8].mxu1 %vm422_vm3, %v342_v57 }
 0x3a5   :  { %2262 = vmatpush3.xpose.msk.msra.mxu0 %vm422_vm3, %v724_v11  ;;  %2267 = vmatpush3.xpose.msk.msra.mxu1 %vm422_vm3, %v724_v11 }
 0x3a6   :  { %2268 = vmatprep.mubr.msk.f32.mxu1 %vm2679_vm2, %v2678_v5  ;;  %2271 = vmatprep.subr.mxu0 %v2678_v5 }
 0x3a7   :  { %2276 = vmatprep.subr.mxu1 %v2678_v5 }
 0x3a8   :  { %v289_v12 = vpop.permute.xlu0 %288  ;;  %2264 = vmatmul.mubr.msk.f32.vlgmr.msra.gmra.mrb[0].mxu0 %vm422_vm3, %v343_v13  ;;  %v311_v46 = vpop.permute.xlu1 %310  ;;  %2269 = vmatmul.mubr.msk.f32.vlgmr.msra.gmra.mrb[10].mxu1 %vm422_vm3, %v344_v14 }
 0x3a9   :  { %v329_v15 = vsel %vm322_vm1, %v287_v10, %v311_v46  ;;  %2273 = vmatprep.mubr.msk.f32.mxu0 %vm2679_vm2, %v2678_v5  ;;  %2278 = vmatprep.mubr.msk.f32.mxu1 %vm2679_vm2, %v2678_v5 }
 0x3aa   :  { %v337_v16 = vmul.f32 %v329_v15, %v2911_v52 }
 0x3ac   :  { %v875_v19 = vpop.permute.xlu0 %874  ;;  %v313_v20 = vpop.permute.xlu1 %312  ;;  %v345_v23 = vadd.f32 %v337_v16, %v256_v18 }
 0x3ad   :  { %v330_v21 = vsel %vm322_vm1, %v289_v12, %v313_v20  ;;  %2272 = vmatpush3.xpose.msk.msra.mxu0 %vm422_vm3, %v875_v19  ;;  %2277 = vmatpush3.xpose.msk.msra.mxu1 %vm422_vm3, %v875_v19 }
 0x3ae   :  { %v338_v25 = vmul.f32 %v330_v21, %v2911_v52  ;;  %2281 = vmatprep.subr.mxu0 %v2678_v5  ;;  %2286 = vmatprep.subr.mxu1 %v2678_v5 }
 0x3b0   :  { %v346_v26 = vadd.f32 %v338_v25, %v257_v22  ;;  %2274 = vmatmul.mubr.msk.f32.vlgmr.msra.gmra.mrb[2].mxu0 %vm422_vm3, %v345_v23 }
 0x3b1   :  { %2283 = vmatprep.mubr.msk.f32.mxu0 %vm2679_vm2, %v2678_v5 }
 0x3b2   :  { %2279 = vmatmul.mubr.msk.f32.vlgmr.msra.gmra.mrb[12].mxu1 %vm422_vm3, %v346_v26 }
 0x3b3   :  { %2288 = vmatprep.mubr.msk.f32.mxu1 %vm2679_vm2, %v2678_v5 }
 0x41e   :  { %v494_v53 = vpop.f32.mrb[2].mxu1 }
 0x41f   :  { %v1024_v24 = vadd.f32 %v494_v53, %v97_v17  ;;  %v2245_v27 = vpop.f32.mrb[3].mxu1 }
 0x421   :  { %v1032_v52 = vsel %vm322_vm1, %v1024_v24, -inf }
 0x422   :  { %1033 = vmax.xlane.f32.xlu1 %v1032_v52  ;;  %v567_v28 = vpop.f32.mrb[4].mxu1 }
 0x423   :  { %v1025_v29 = vadd.f32 %v567_v28, %v97_v17  ;;  %v2250_v30 = vpop.f32.mrb[5].mxu1 }
 0x425   :  { %v1035_v33 = vsel %vm322_vm1, %v1025_v29, -inf }
 0x426   :  { %1036 = vmax.xlane.f32.xlu0 %v1035_v33 }
 0x473   :  { %v645_v35 = vpop.f32.mrb[6].mxu1 }
 0x474   :  { %v1026_v38 = vadd.f32 %v645_v35, %v97_v17  ;;  %v2255_v39 = vpop.f32.mrb[7].mxu1 }
 0x476   :  { %v1038_v40 = vsel %vm322_vm1, %v1026_v38, -inf }
 0x477   :  { %1039 = vmax.xlane.f32.xlu0 %v1038_v40  ;;  %v718_v41 = vpop.f32.mrb[8].mxu1 }
 0x478   :  { %v1027_v42 = vadd.f32 %v718_v41, %v97_v17  ;;  %v2260_v44 = vpop.f32.mrb[9].mxu1 }
 0x47a   :  { %v1041_v48 = vsel %vm322_vm1, %v1027_v42, -inf }
 0x47b   :  { %v796_v49 = vpop.f32.mrb[0].mxu0  ;;  %1042 = vmax.xlane.f32.xlu1 %v1041_v48  ;;  %v869_v50 = vpop.f32.mrb[10].mxu1 }
 0x47c   :  { %v1028_v51 = vadd.f32 %v796_v49, %v98_v47  ;;  %v1029_v54 = vadd.f32 %v869_v50, %v98_v47  ;;  %v2265_v55 = vpop.f32.mrb[1].mxu0  ;;  %v2270_v56 = vpop.f32.mrb[11].mxu1 }
 0x47e   :  { %v1044_v57 = vsel %vm322_vm1, %v1028_v51, -inf  ;;  %v1047_v58 = vsel %vm322_vm1, %v1029_v54, -inf }
 0x47f   :  { %1045 = vmax.xlane.f32.xlu0 %v1044_v57  ;;  %1048 = vmax.xlane.f32.xlu1 %v1047_v58 }
 0x483   :  { %v947_v59 = vpop.f32.mrb[2].mxu0 }
 0x484   :  { %v1030_v60 = vadd.f32 %v947_v59, %v98_v47  ;;  %v2275_v61 = vpop.f32.mrb[3].mxu0 }
 0x485   :  { %v1020_v43 = vpop.f32.mrb[12].mxu1 }
 0x486   :  { %v1031_v37 = vadd.f32 %v1020_v43, %v98_v47  ;;  %v2280_v62 = vpop.f32.mrb[13].mxu1  ;;  %v1050_v63 = vsel %vm322_vm1, %v1030_v60, -inf }
 0x487   :  { %1051 = vmax.xlane.f32.xlu0 %v1050_v63 }
 0x488   :  { %v1053_v3 = vsel %vm322_vm1, %v1031_v37, -inf }
 0x489   :  { %1054 = vmax.xlane.f32.xlu1 %v1053_v3 }
 0x4af   :  { %v1034_v8 = vpop.xlane.xlu1 %1033 }
 0x4b0   :  { %v1056_v13 = vsub.f32 %v1024_v24, %v1034_v8 }
 0x4b2   :  { %v1064_v18 = vmul.f32 1.442695, %v1056_v13  ;;  %v1758_v13 = vld [vmem:[#allocation8 + $0x10] sm:$0xff] }
 0x4b3   :  { %v1037_v45 = vpop.xlane.xlu0 %1036 }
 0x4b4   :  { %v1057_v2 = vsub.f32 %v1025_v29, %v1037_v45 }
 0x4b6   :  { %v1066_v4 = vmul.f32 1.442695, %v1057_v2 }
 0x4b8   :  { %2479 = vpow2.f32 %v1066_v4 }
 0x4c2   :  { %v2480_v6 = vpop.eup %2479 }
 0x4c3   :  { %v1083_v7 = vsel %vm322_vm1, %v2480_v6, 0.0 }
 0x4c4   :  { %1084 = vadd.xlane.f32.xlu1 %v1083_v7 }
 0x4d5   :  { %1277 = vrot.lane.b32.xlu1 %v2876_v34, %s2680_s27 }
 0x504   :  { %v1040_v9 = vpop.xlane.xlu0 %1039 }
 0x505   :  { %v1058_v21 = vsub.f32 %v1026_v38, %v1040_v9 }
 0x507   :  { %v1068_v23 = vmul.f32 1.442695, %v1058_v21  ;;  %v1762_v21 = vld [vmem:[#allocation8 + $0x30] sm:$0xff] }
 0x508   :  { %v1043_v10 = vpop.xlane.xlu1 %1042 }
 0x509   :  { %v1059_v11 = vsub.f32 %v1027_v42, %v1043_v10  ;;  %v1756_v10 = vld [vmem:[#allocation8] sm:$0xff] }
 0x50b   :  { %v1070_v14 = vmul.f32 1.442695, %v1059_v11  ;;  %v1757_v11 = vld [vmem:[#allocation8 + $0x8] sm:$0xff] }
 0x50c   :  { %v1046_v12 = vpop.xlane.xlu0 %1045  ;;  %v1049_v46 = vpop.xlane.xlu1 %1048 }
 0x50d   :  { %2481 = vpow2.f32 %v1070_v14  ;;  %v1060_v15 = vsub.f32 %v1028_v51, %v1046_v12  ;;  %v1061_v16 = vsub.f32 %v1029_v54, %v1049_v46  ;;  %v2391_v14 = vpack.c.bf16 %v1757_v11, %v1756_v10  ;;  %v1759_v12 = vld [vmem:[#allocation8 + $0x18] sm:$0xff]  ;;  %v1879_v10 = vld [vmem:[%s3269_s6 + $0x40] sm:$0xff]  ;;  %v1881_v11 = vld [vmem:[%s3269_s6 + $0x50] sm:$0xff] }
 0x50e   :  { %v2395_v46 = vpack.c.bf16 %v1759_v12, %v1758_v13  ;;  %v2417_v13 = vpack.c.bf16 %v1881_v11, %v1879_v10  ;;  %v1886_v12 = vld [vmem:[%s3269_s6 + $0x78] sm:$0xff] }
 0x50f   :  { %v1072_v19 = vmul.f32 1.442695, %v1060_v15  ;;  %v1074_v20 = vmul.f32 1.442695, %v1061_v16  ;;  %v1760_v15 = vld [vmem:[#allocation8 + $0x20] sm:$0xff]  ;;  %v1761_v16 = vld [vmem:[#allocation8 + $0x28] sm:$0xff] }
 0x511   :  { %2483 = vpow2.f32 %v1072_v19 }
 0x512   :  { %2485 = vpow2.f32 %v1074_v20 }
 0x513   :  { %2487 = vpow2.f32 %v1064_v18  ;;  %v2399_v18 = vpack.c.bf16 %v1761_v16, %v1760_v15  ;;  %v1883_v15 = vld [vmem:[%s3269_s6 + $0x60] sm:$0xff]  ;;  %v1885_v16 = vld [vmem:[%s3269_s6 + $0x70] sm:$0xff] }
 0x514   :  { %v1052_v22 = vpop.xlane.xlu0 %1051 }
 0x515   :  { %v1062_v34 = vsub.f32 %v1030_v60, %v1052_v22  ;;  %v1763_v22 = vld [vmem:[#allocation8 + $0x38] sm:$0xff] }
 0x516   :  { %v1055_v25 = vpop.xlane.xlu1 %1054 }
 0x517   :  { %v2482_v26 = vpop.eup %2481  ;;  %v1076_v17 = vmul.f32 1.442695, %v1062_v34  ;;  %v1063_v53 = vsub.f32 %v1031_v37, %v1055_v25  ;;  %v2403_v25 = vpack.c.bf16 %v1763_v22, %v1762_v21 }
 0x518   :  { %v1089_v24 = vsel %vm322_vm1, %v2482_v26, 0.0 }
 0x519   :  { %2489 = vpow2.f32 %v1076_v17  ;;  %v1078_v27 = vmul.f32 1.442695, %v1063_v53  ;;  %1090 = vadd.xlane.f32.xlu1 %v1089_v24 }
 0x51a   :  { %2491 = vpow2.f32 %v1068_v23 }
 0x51b   :  { %v2484_v52 = vpop.eup %2483  ;;  %2493 = vpow2.f32 %v1078_v27 }
 0x51c   :  { %v2486_v28 = vpop.eup %2485  ;;  %v1092_v29 = vsel %vm322_vm1, %v2484_v52, 0.0 }
 0x51d   :  { %v2488_v30 = vpop.eup %2487  ;;  %1093 = vadd.xlane.f32.xlu0 %v1092_v29  ;;  %v1095_v33 = vsel %vm322_vm1, %v2486_v28, 0.0 }
 0x51e   :  { %1096 = vadd.xlane.f32.xlu1 %v1095_v33  ;;  %v1080_v35 = vsel %vm322_vm1, %v2488_v30, 0.0 }
 0x521   :  { %1081 = vadd.xlane.f32.xlu0 %v1080_v35 }
 0x523   :  { %v2490_v38 = vpop.eup %2489 }
 0x524   :  { %v3059_v39 = vpop.eup %2491  ;;  %v1098_v40 = vsel %vm322_vm1, %v2490_v38, 0.0 }
 0x525   :  { %v2494_v41 = vpop.eup %2493  ;;  %1099 = vadd.xlane.f32.xlu0 %v1098_v40  ;;  %v1086_v44 = vsel %vm322_vm1, %v3059_v39, 0.0 }
 0x526   :  { %v1101_v42 = vsel %vm322_vm1, %v2494_v41, 0.0 }
 0x527   :  { %1102 = vadd.xlane.f32.xlu1 %v1101_v42 }
 0x529   :  { %1087 = vadd.xlane.f32.xlu0 %v1086_v44 }
 0x538   :  { %1426 = vrot.lane.b32.xlu1 %v2866_v31, %s2680_s27 }
 0x53f   :  { %1128 = vrot.lane.b32.xlu0 %v2868_v32, %s2680_s27 }
 0x543   :  { %1575 = vrot.lane.b32.xlu0 %v2880_v36, %s2680_s27 }
 0x551   :  { %v1085_v47 = vpop.xlane.xlu1 %1084 }
 0x552   :  { %2495 = vrcp.f32 %v1085_v47 }
 0x555   :  { %v1278_v50 = vpop.permute.xlu1 %1277 }
 0x55c   :  { %v2496_v48 = vpop.eup %2495 }
 0x55d   :  { %v1107_v49 = vmul.f32 %v2496_v48, %v2480_v6 }
 0x55f   :  { %1121 = vst.msk [vmem:[#allocation11 + $0x8] sm:$0xff] %vm322_vm1, %v1107_v49 }
 0x5a6   :  { %v1091_v51 = vpop.xlane.xlu1 %1090 }
 0x5a7   :  { %2497 = vrcp.f32 %v1091_v51 }
 0x5aa   :  { %v1094_v54 = vpop.xlane.xlu0 %1093 }
 0x5ab   :  { %2499 = vrcp.f32 %v1094_v54  ;;  %v1097_v55 = vpop.xlane.xlu1 %1096 }
 0x5ac   :  { %2501 = vrcp.f32 %v1097_v55 }
 0x5ae   :  { %v1082_v31 = vpop.xlane.xlu0 %1081 }
 0x5af   :  { %2503 = vrcp.f32 %v1082_v31 }
 0x5b1   :  { %v2498_v56 = vpop.eup %2497 }
 0x5b2   :  { %v1111_v32 = vmul.f32 %v2498_v56, %v2482_v26  ;;  %v1100_v57 = vpop.xlane.xlu0 %1099 }
 0x5b3   :  { %2505 = vrcp.f32 %v1100_v57 }
 0x5b4   :  { %1123 = vst.msk [vmem:[#allocation11 + $0x18] sm:$0xff] %vm322_vm1, %v1111_v32  ;;  %v1103_v36 = vpop.xlane.xlu1 %1102 }
 0x5b5   :  { %v2500_v58 = vpop.eup %2499  ;;  %2507 = vrcp.f32 %v1103_v36 }
 0x5b6   :  { %v2502_v59 = vpop.eup %2501  ;;  %v1113_v60 = vmul.f32 %v2500_v58, %v2484_v52  ;;  %v1088_v61 = vpop.xlane.xlu0 %1087 }
 0x5b7   :  { %v1115_v43 = vmul.f32 %v2502_v59, %v2486_v28  ;;  %2509 = vrcp.f32 %v1088_v61 }
 0x5b8   :  { %1124 = vst.msk [vmem:[#allocation11 + $0x20] sm:$0xff] %vm322_vm1, %v1113_v60  ;;  %v1427_v6 = vpop.permute.xlu1 %1426 }
 0x5b9   :  { %v2504_v37 = vpop.eup %2503  ;;  %1125 = vst.msk [vmem:[#allocation11 + $0x28] sm:$0xff] %vm322_vm1, %v1115_v43 }
 0x5ba   :  { %v1105_v62 = vmul.f32 %v2504_v37, %v2488_v30  ;;  %v1129_v63 = vpop.permute.xlu0 %1128  ;;  %v1873_v37 = vld [vmem:[%s3269_s6 + $0x10] sm:$0xff] }
 0x5bb   :  { %2282 = vmatpush3.msra.mxu0 %v1129_v63  ;;  %2287 = vmatpush3.msra.mxu1 %v1129_v63  ;;  %v1876_v63 = vld [vmem:[%s3269_s6 + $0x28] sm:$0xff] }
 0x5bc   :  { %1120 = vst.msk [vmem:[#allocation11] sm:$0xff] %vm322_vm1, %v1105_v62  ;;  %2284 = vmatmul.mubr.msk.f32.vlgmr.msra.gmra.mrb[4].mxu0 %vm322_vm1, %v1105_v62  ;;  %2289 = vmatmul.mubr.msk.f32.vlgmr.msra.gmra.mrb[14].mxu1 %vm322_vm1, %v1107_v49 }
 0x5bd   :  { %v2506_v3 = vpop.eup %2505  ;;  %2291 = vmatprep.subr.mxu0 %v2678_v5  ;;  %2296 = vmatprep.subr.mxu1 %v2678_v5 }
 0x5be   :  { %v1117_v45 = vmul.f32 %v2506_v3, %v2490_v38  ;;  %2292 = vmatpush3.msra.mxu0 %v1278_v50  ;;  %2297 = vmatpush3.msra.mxu1 %v1278_v50  ;;  %v1576_v9 = vpop.permute.xlu0 %1575  ;;  %v1878_v3 = vld [vmem:[%s3269_s6 + $0x38] sm:$0xff] }
 0x5bf   :  { %v2508_v2 = vpop.eup %2507  ;;  %2298 = vmatprep.mubr.msk.f32.mxu1 %vm2679_vm2, %v2678_v5  ;;  %2306 = vmatprep.subr.mxu1 %v2678_v5 }
 0x5c0   :  { %1126 = vst.msk [vmem:[#allocation11 + $0x30] sm:$0xff] %vm322_vm1, %v1117_v45  ;;  %v1119_v4 = vmul.f32 %v2508_v2, %v2494_v41  ;;  %2299 = vmatmul.mubr.msk.f32.vlgmr.msra.gmra.mrb[16].mxu1 %vm322_vm1, %v1111_v32  ;;  %2293 = vmatprep.mubr.msk.f32.mxu0 %vm2679_vm2, %v2678_v5  ;;  %v1875_v2 = vld [vmem:[%s3269_s6 + $0x20] sm:$0xff] }
 0x5c1   :  { %v2510_v7 = vpop.eup %2509  ;;  %2307 = vmatpush3.msra.mxu1 %v1427_v6  ;;  %2301 = vmatprep.subr.mxu0 %v2678_v5 }
 0x5c2   :  { %1127 = vst.msk [vmem:[#allocation11 + $0x38] sm:$0xff] %vm322_vm1, %v1119_v4  ;;  %v1109_v8 = vmul.f32 %v2510_v7, %v3059_v39  ;;  %2308 = vmatprep.mubr.msk.f32.mxu1 %vm2679_vm2, %v2678_v5  ;;  %2316 = vmatprep.subr.mxu1 %v2678_v5  ;;  %v1880_v7 = vld [vmem:[%s3269_s6 + $0x48] sm:$0xff] }
 0x5c4   :  { %1122 = vst.msk [vmem:[#allocation11 + $0x10] sm:$0xff] %vm322_vm1, %v1109_v8  ;;  %2294 = vmatmul.mubr.msk.f32.vlgmr.msra.gmra.mrb[6].mxu0 %vm322_vm1, %v1109_v8  ;;  %2309 = vmatmul.mubr.msk.f32.vlgmr.msra.gmra.mrb[18].mxu1 %vm322_vm1, %v1115_v43  ;;  %v1871_v43 = vld [vmem:[%s3269_s6] sm:$0xff]  ;;  %v1882_v8 = vld [vmem:[%s3269_s6 + $0x58] sm:$0xff] }
 0x5c5   :  { %2302 = vmatpush3.msra.mxu0 %v1427_v6  ;;  %2317 = vmatpush3.msra.mxu1 %v1576_v9  ;;  %v2409_v62 = vpack.c.bf16 %v1873_v37, %v1871_v43 }
 0x5c6   :  { %2303 = vmatprep.mubr.msk.f32.mxu0 %vm2679_vm2, %v2678_v5  ;;  %2311 = vmatprep.subr.mxu0 %v2678_v5 }
 0x5c7   :  { %2318 = vmatprep.mubr.msk.f32.mxu1 %vm2679_vm2, %v2678_v5 }
 0x5c8   :  { %2304 = vmatmul.mubr.msk.f32.vlgmr.msra.gmra.mrb[8].mxu0 %vm322_vm1, %v1113_v60  ;;  %2319 = vmatmul.mubr.msk.f32.vlgmr.msra.gmra.mrb[20].mxu1 %vm322_vm1, %v1119_v4  ;;  %v1877_v4 = vld [vmem:[%s3269_s6 + $0x30] sm:$0xff] }
 0x5c9   :  { %2312 = vmatpush3.msra.mxu0 %v1576_v9  ;;  %2313 = vmatprep.mubr.msk.f32.mxu0 %vm2679_vm2, %v2678_v5  ;;  %v2413_v6 = vpack.c.bf16 %v1877_v4, %v1875_v2  ;;  %v2415_v9 = vpack.c.bf16 %v1882_v8, %v1880_v7 }
 0x5ca   :  { %1957 = vmatprep.mubr.f32.mxu1 %v2678_v5  ;;  %2392 = vmatprep.subr.bf16.mxu0 %v2391_v14 }
 0x5cc   :  { %2314 = vmatmul.mubr.msk.f32.vlgmr.msra.gmra.mrb[10].mxu0 %vm322_vm1, %v1117_v45  ;;  %v2411_v45 = vpack.c.bf16 %v1878_v3, %v1876_v63 }
 0x5cd   :  { %2394 = vmatpush3.bf16.msra.mxu0 %v2391_v14  ;;  %v1884_v14 = vld [vmem:[%s3269_s6 + $0x68] sm:$0xff] }
 0x5ce   :  { %2396 = vmatprep.subr.bf16.mxu0 %v2395_v46 }
 0x5d1   :  { %2398 = vmatpush3.bf16.msra.mxu0 %v2395_v46  ;;  %v2419_v46 = vpack.c.bf16 %v1886_v12, %v1884_v14 }
 0x5d2   :  { %2400 = vmatprep.subr.bf16.mxu0 %v2399_v18 }
 0x5d5   :  { %2402 = vmatpush3.bf16.msra.mxu0 %v2399_v18  ;;  %v2421_v18 = vpack.c.bf16 %v1885_v16, %v1883_v15 }
 0x5d6   :  { %2404 = vmatprep.subr.bf16.mxu0 %v2403_v25 }
 0x5d9   :  { %2406 = vmatpush3.bf16.msra.mxu0 %v2403_v25 }
 0x68f   :  { %v1200_v19 = vpop.f32.mrb[4].mxu0  ;;  %v1273_v20 = vpop.f32.mrb[14].mxu1 }
 0x690   :  { %v2285_v34 = vpop.f32.mrb[5].mxu0  ;;  %1725 = vrot.lane.b32.xlu1 %v1273_v20, %s2681_s16  ;;  %v2290_v23 = vpop.f32.mrb[15].mxu1 }
 0x693   :  { %v1422_v26 = vpop.f32.mrb[16].mxu1 }
 0x694   :  { %v2300_v17 = vpop.f32.mrb[17].mxu1 }
 0x695   :  { %v2147_v17 = vld [vmem:[%s3272_s9] ss:$0 sm:$0xff] }
 0x697   :  { %v1349_v53 = vpop.f32.mrb[6].mxu0  ;;  %v1571_v24 = vpop.f32.mrb[18].mxu1 }
 0x698   :  { %1729 = vrot.lane.b32.xlu0 %v1349_v53, %s2680_s27  ;;  %v2295_v27 = vpop.f32.mrb[7].mxu0  ;;  %1742 = vrot.lane.b32.xlu1 %v1571_v24, %s2681_s16  ;;  %v2310_v52 = vpop.f32.mrb[19].mxu1 }
 0x69b   :  { %v1498_v28 = vpop.f32.mrb[8].mxu0  ;;  %v1720_v29 = vpop.f32.mrb[20].mxu1 }
 0x69c   :  { %v2305_v30 = vpop.f32.mrb[9].mxu0  ;;  %1733 = vrot.lane.b32.xlu0 %v1422_v26, %s2682_s17  ;;  %v2320_v33 = vpop.f32.mrb[21].mxu1 }
 0x69d   :  { %v1988_v33 = vld [vmem:[%s3270_s7 + $0x10] sm:$0xff] }
 0x69f   :  { %v1647_v35 = vpop.f32.mrb[10].mxu0 }
 0x6a0   :  { %v2315_v38 = vpop.f32.mrb[11].mxu0  ;;  %1746 = vrot.lane.b32.xlu1 %v1647_v35, %s2680_s27  ;;  %1750 = vrot.lane.b32.xlu0 %v1720_v29, %s2682_s17  ;;  %v1987_v29 = vld [vmem:[%s3270_s7 + $0x8] sm:$0xff] }
 0x6a1   :  { %v1990_v38 = vld [vmem:[%s3270_s7 + $0x20] sm:$0xff] }
 0x702   :  { %v1726_v39 = vpop.permute.xlu1 %1725 }
 0x703   :  { %v1736_v41 = vsel %vm422_vm3, %v1200_v19, %v1726_v39  ;;  %v1991_v39 = vld [vmem:[%s3270_s7 + $0x28] sm:$0xff] }
 0x70a   :  { %v1730_v40 = vpop.permute.xlu0 %1729  ;;  %v1743_v44 = vpop.permute.xlu1 %1742 }
 0x70b   :  { %v1738_v42 = vsel %vm1737_vm4, %v1736_v41, %v1730_v40  ;;  %v1753_v49 = vsel %vm422_vm3, %v1498_v28, %v1743_v44  ;;  %v1986_v28 = vld [vmem:[%s3270_s7] sm:$0xff]  ;;  %v2431_v40 = vpack.c.bf16 %v1991_v39, %v1990_v38  ;;  %v1992_v41 = vld [vmem:[%s3270_s7 + $0x30] sm:$0xff] }
 0x70c   :  { %v2423_v30 = vpack.c.bf16 %v1987_v29, %v1986_v28 }
 0x70e   :  { %v1734_v47 = vpop.permute.xlu0 %1733  ;;  %2424 = vmatprep.subr.bf16.mxu0 %v2423_v30 }
 0x70f   :  { %v1740_v48 = vsel %vm1739_vm5, %v1738_v42, %v1734_v47  ;;  %v1993_v42 = vld [vmem:[%s3270_s7 + $0x38] sm:$0xff]  ;;  %v1994_v47 = vld [vmem:[%s3270_s7 + $0x40] sm:$0xff] }
 0x710   :  { %2337 = vmatprep.mubr.msk.f32.mxu0 %vm107_vm0, %v1740_v48  ;;  %v2435_v44 = vpack.c.bf16 %v1993_v42, %v1992_v41  ;;  %v1995_v48 = vld [vmem:[%s3270_s7 + $0x48] sm:$0xff] }
 0x712   :  { %v1747_v50 = vpop.permute.xlu1 %1746  ;;  %v1751_v51 = vpop.permute.xlu0 %1750 }
 0x713   :  { %v1754_v54 = vsel %vm1737_vm4, %v1753_v49, %v1747_v50  ;;  %v2439_v49 = vpack.c.bf16 %v1995_v48, %v1994_v47  ;;  %v1996_v50 = vld [vmem:[%s3270_s7 + $0x50] sm:$0xff] }
 0x714   :  { %v1755_v55 = vsel %vm1739_vm5, %v1754_v54, %v1751_v51  ;;  %v1997_v51 = vld [vmem:[%s3270_s7 + $0x58] sm:$0xff] }
 0x715   :  { %2338 = vmatmul.mubr.msk.f32.vlgmr.msra.gmra.mrb[12].mxu0 %vm107_vm0, %v1755_v55  ;;  %v2443_v54 = vpack.c.bf16 %v1997_v51, %v1996_v50  ;;  %v1998_v55 = vld [vmem:[%s3270_s7 + $0x60] sm:$0xff] }
 0x716   :  { %2426 = vmatpush3.bf16.msra.mxu0 %v2423_v30 }
 0x7e8   :  { %v2339_v31 = vpop.f32.mrb[12].mxu0 }
 0x7e9   :  { %v3114_v56 = vadd.f32 %v2339_v31, %v2827_v1  ;;  %v1836_v32 = vpop.f32.mrb[13].mxu0  ;;  %v1872_v1 = vld [vmem:[%s3269_s6 + $0x8] sm:$0xff] }
 0x7ea   :  { %v3117_v57 = vadd.f32 %v1836_v32, %v2822_v0  ;;  %v1874_v0 = vld [vmem:[%s3269_s6 + $0x18] sm:$0xff]  ;;  %v1999_v31 = vld [vmem:[%s3270_s7 + $0x68] sm:$0xff] }
 0x7eb   :  { %v1848_v36 = vmul.f32 %v3114_v56, %v3114_v56  ;;  %v2407_v61 = vpack.c.bf16 %v1874_v0, %v1872_v1  ;;  %v2447_v32 = vpack.c.bf16 %v1999_v31, %v1998_v55 }
 0x7ec   :  { %v1847_v58 = vmul.f32 %v3117_v57, %v3117_v57 }
 0x7ed   :  { %v1852_v59 = vsel %vm107_vm0, %v1848_v36, 0.0  ;;  %2408 = vmatprep.subr.bf16.mxu1 %v2407_v61  ;;  %v2000_v36 = vld [vmem:[%s3270_s7 + $0x70] sm:$0xff] }
 0x7ee   :  { %1853 = vadd.xlane.f32.xlu0 %v1852_v59  ;;  %v1849_v60 = vsel %vm107_vm0, %v1847_v58, 0.0  ;;  %2410 = vmatpush1.bf16.msra.mxu1 %v2409_v62  ;;  %v2001_v58 = vld [vmem:[%s3270_s7 + $0x78] sm:$0xff] }
 0x7ef   :  { %1850 = vadd.xlane.f32.xlu1 %v1849_v60  ;;  %2412 = vmatprep.subr.bf16.mxu1 %v2411_v45  ;;  %v2451_v59 = vpack.c.bf16 %v2001_v58, %v2000_v36 }
 0x7f2   :  { %2414 = vmatpush1.bf16.msra.mxu1 %v2413_v6 }
 0x7f3   :  { %2416 = vmatprep.subr.bf16.mxu1 %v2415_v9 }
 0x7f6   :  { %2418 = vmatpush1.bf16.msra.mxu1 %v2417_v13 }
 0x7f7   :  { %2420 = vmatprep.subr.bf16.mxu1 %v2419_v46 }
 0x7fa   :  { %2422 = vmatpush1.bf16.msra.mxu1 %v2421_v18 }
 0x87b   :  { %v1854_v19 = vpop.xlane.xlu0 %1853 }
 0x87c   :  { %v1856_v20 = vmul.f32 0.015625, %v1854_v19  ;;  %v1851_v21 = vpop.xlane.xlu1 %1850 }
 0x87d   :  { %v1855_v22 = vmul.f32 0.015625, %v1851_v21 }
 0x87e   :  { %v1858_v34 = vadd.f32 1e-06, %v1856_v20 }
 0x87f   :  { %v1857_v23 = vadd.f32 1e-06, %v1855_v22 }
 0x880   :  { %2511 = vrsqrt.f32 %v1858_v34 }
 0x881   :  { %2513 = vrsqrt.f32 %v1857_v23 }
 0x88a   :  { %v2512_v25 = vpop.eup %2511 }
 0x88b   :  { %v2514_v26 = vpop.eup %2513  ;;  %v1862_v27 = vmul.f32 %v2512_v25, %v3114_v56 }
 0x88c   :  { %v1861_v53 = vmul.f32 %v2514_v26, %v3117_v57 }
 0x88d   :  { %v1870_v52 = vmul.f32 %v2147_v17, %v1862_v27 }
 0x88e   :  { %v1869_v24 = vmul.f32 %v2147_v17, %v1861_v53 }
 0x890   :  { %2148 = vmatmul.mubr.msk.f32.vlgmr.msra.gmra.mrb[22].mxu1 %vm107_vm0, %v1869_v24 }
 0x891   :  { %1963 = vmatprep.mubr.f32.mxu1 %v2678_v5  ;;  %v1989_v5 = vld [vmem:[%s3270_s7 + $0x18] sm:$0xff]  ;;  %s2683_s7 = smov [#allocation11]  }
 0x892   :  { %v2427_v35 = vpack.c.bf16 %v1989_v5, %v1988_v33  ;;  %s2099_s4 = sshll.u32 %s2683_s7, 4  ;;  %s2100_s4 = int_to_ptr.vmem [resolvable:$true] %s2099_s4 }
 0x893   :  { %s2611_s8 = scalar_lea.vmem %s2100_s4, 1024  ;;  %p2616_p5 = scmp.lt.s32.totalorder %s2100_s4, %s2100_s4 }
 0x894   :  { %2149 = vmatmul.mubr.msk.f32.gmra.mrb[24].mxu1 %vm107_vm0, %v1870_v52  ;;  %2428 = vmatprep.subr.bf16.mxu0 %v2427_v35  ;;  %p2612_p4 = scmp.ne.s32.totalorder %s2100_s4, %s2611_s8  ;;  %p2617_p6 = scmp.lt.s32.totalorder %s2611_s8, %s2611_s8 }
 0x895   :  { %2430 = vmatpush3.bf16.msra.mxu0 %v2427_v35 }
 0x896   :  { %2432 = vmatprep.subr.bf16.mxu0 %v2431_v40  ;;  %p2618_p7 = por %p2617_p6, %p2616_p5 }
 0x898   :  { %p2619_p8 = pnand %p2618_p7, %p2612_p4 }
 0x899   :  { %2434 = vmatpush3.bf16.msra.mxu0 %v2431_v40 }
 0x89a   :  { %2436 = vmatprep.subr.bf16.mxu0 %v2435_v44 }
 0x89d   :  { %2438 = vmatpush3.bf16.msra.mxu0 %v2435_v44 }
 0x89e   :  { %2440 = vmatprep.subr.bf16.mxu0 %v2439_v49 }
 0x8a1   :  { %2442 = vmatpush3.bf16.msra.mxu0 %v2439_v49 }
 0x8a2   :  { %2444 = vmatprep.subr.bf16.mxu0 %v2443_v54 }
 0x8a5   :  { %2446 = vmatpush3.bf16.msra.mxu0 %v2443_v54 }
 0x8a6   :  { %2448 = vmatprep.subr.bf16.mxu0 %v2447_v32 }
 0x8a9   :  { %2450 = vmatpush3.bf16.msra.mxu0 %v2447_v32 }
 0x8aa   :  { %2452 = vmatprep.subr.bf16.mxu0 %v2451_v59 }
 0x8ad   :  { %2454 = vmatpush3.bf16.msra.mxu0 %v2451_v59 }
 0x963   :  { %v1959_v60 = vpop.f32.mrb[22].mxu1 }
 0x964   :  { %v2150_v1 = vmul.f32 -1.442695, %v1959_v60  ;;  %v1961_v0 = vpop.f32.mrb[23].mxu1 }
 0x966   :  { %2515 = vpow2.f32 %v2150_v1 }
 0x967   :  { %v1965_v61 = vpop.f32.mrb[24].mxu1 }
 0x968   :  { %v2151_v43 = vmul.f32 -1.442695, %v1965_v61  ;;  %v1967_v37 = vpop.f32.mrb[25].mxu1 }
 0x96a   :  { %2517 = vpow2.f32 %v2151_v43 }
 0x970   :  { %v2516_v62 = vpop.eup %2515 }
 0x971   :  { %v1976_v63 = vadd.f32 1.0, %v2516_v62 }
 0x973   :  { %2519 = vrcp.f32 %v1976_v63 }
 0x974   :  { %v2518_v3 = vpop.eup %2517 }
 0x975   :  { %v1977_v45 = vadd.f32 1.0, %v2518_v3 }
 0x977   :  { %2521 = vrcp.f32 %v1977_v45 }
 0x97d   :  { %v2520_v2 = vpop.eup %2519 }
 0x97e   :  { %v1982_v4 = vmul.f32 %v2520_v2, %v1959_v60 }
 0x980   :  { %v1984_v6 = vmul.f32 %v1982_v4, %v1961_v0 }
 0x981   :  { %v2522_v7 = vpop.eup %2521 }
 0x982   :  { %v1983_v8 = vmul.f32 %v2522_v7, %v1965_v61  ;;  %2372 = vmatprep.mubr.f32.mxu0 %v1984_v6 }
 0x984   :  { %v1985_v9 = vmul.f32 %v1983_v8, %v1967_v37 }
 0x986   :  { %2373 = vmatmul.mubr.f32.vlgmr.msra.gmra.mrb[14].mxu0 %v1985_v9 }
 0x987   :  { %2622 = shalt.err (!%p2619_p8)
}
 0x988   :  { %s2623_s14 = scalar_lea.hbm %s3274_s11, 1024 }
 0x989   :  { %p2624_p9 = scmp.ne.s32.totalorder %s3274_s11, %s2623_s14  ;;  %p2627_p10 = scmp.lt.u32.totalorder %s2623_s14, %s3274_s11 }
 0x98b   :  { %p2629_p11 = pnand %p2627_p10, %p2624_p9 }
 0x98d   :  { %2632 = shalt.err (!%p2629_p11)
}
 0x98e   :  { %2105 = dma.vmem_to_hbm [thread:$0]  %s2100_s4, 1024, %s3274_s11, [#allocation12], %s2667_s29, %s2667_s29, %s2668_s30  }
 0x98f   :  { %s2684_s1 = smov [#allocation10]  }
 0x990   :  { %s2087_s20 = sshll.u32 %s2684_s1, 4  ;;  %s2088_s20 = int_to_ptr.vmem [resolvable:$true] %s2087_s20 }
 0x991   :  { %s2633_s19 = scalar_lea.vmem %s2088_s20, 256  ;;  %p2638_p13 = scmp.lt.s32.totalorder %s2088_s20, %s2088_s20 }
 0x992   :  { %p2634_p12 = scmp.ne.s32.totalorder %s2088_s20, %s2633_s19  ;;  %p2639_p0 = scmp.lt.s32.totalorder %s2633_s19, %s2633_s19 }
 0x994   :  { %p2640_p1 = por %p2639_p0, %p2638_p13 }
 0x996   :  { %p2641_p2 = pnand %p2640_p1, %p2634_p12 }
 0xa59   :  { %v2374_v10 = vpop.f32.mrb[14].mxu0 }
 0xa5a   :  { %v2078_v11 = vadd.f32 %v2374_v10, %v3114_v56  ;;  %v2068_v13 = vpop.f32.mrb[15].mxu0 }
 0xa5b   :  { %v2077_v14 = vadd.f32 %v2068_v13, %v3117_v57 }
 0xa5c   :  { %2081 = vst.msk [vmem:[#allocation10 + $0x8] sm:$0xff] %vm107_vm0, %v2078_v11 }
 0xa5d   :  { %2079 = vst.msk [vmem:[#allocation10] sm:$0xff] %vm107_vm0, %v2077_v14 }
 0xa5e   :  { %2644 = shalt.err (!%p2641_p2)
}
 0xa5f   :  { %s2645_s22 = scalar_lea.hbm %s3273_s10, 256 }
 0xa60   :  { %p2646_p3 = scmp.ne.s32.totalorder %s3273_s10, %s2645_s22  ;;  %p2649_p4 = scmp.lt.u32.totalorder %s2645_s22, %s3273_s10 }
 0xa62   :  { %p2651_p5 = pnand %p2649_p4, %p2646_p3 }
 0xa64   :  { %2654 = shalt.err (!%p2651_p5)
}
 0xa65   :  { %2093 = dma.vmem_to_hbm [thread:$0]  %s2088_s20, 256, %s3273_s10, [#allocation4], %s2667_s29, %s2667_s29, %s2668_s30  }
 0xa66   :  { %2661 = dma.done.wait [#allocation4], 256  }
 0xa67   :  { %2662 = vsyncadd [#allocation4], 4294967040 }
 0xa68   :  { %2663 = dma.done.wait [#allocation12], 1024  }
 0xa69   :  { %2664 = vsyncadd [#allocation12], 4294966272 }
 0xa6a   :  { %2112 = vsyncpa [#allocation3], 1 }
 0xa6b   :  { %2113 = vsyncpa [#allocation6], 1 }
 0xa6c   :  { %2114 = vsyncpa [#allocation9], 1 }
 0xa6d   :  { %2115 = vsyncpa [#allocation4], 1 }
 0xa6e   :  { %2116 = vsyncpa [#allocation12], 1 }

</bundles_post_ra>
